<compile_context>
chip_gen: v5e
topology: v5e:2x2
jax: 0.10.0
libtpu: 0.0.40
codegen_flags: <defaults>
</compile_context>

<pallas_src>
import jax
import jax.numpy as jnp
from jax.experimental import pallas as pl
from jax.experimental.pallas import tpu as pltpu


# --------------------------------------------------------------------------
# Fused kernel: embedding gather + input projection + LSTM recurrence + fc.
# Argument order (PrefetchScalarGridSpec): scalar-prefetch refs, inputs,
# outputs, scratch.
# --------------------------------------------------------------------------
def fused_decoder_kernel(cap_ref,                       # SMEM (B, S) int32
                         feat_ref, embed_ref, w_ih_ref, w_hh_ref, b_ref,
                         fc_w_ref, fc_b_ref,            # VMEM inputs
                         out_ref,                       # VMEM (B, T, V) output
                         x_sc, gx_sc, hs_sc):           # VMEM scratch
    B, S = cap_ref.shape
    T = S
    H = w_hh_ref.shape[0]
    V = fc_w_ref.shape[1]

    # ---- (1) Build the LSTM input sequence in VMEM, time-major, flattened:
    #      row t*B + b = features[b]            for t == 0
    #                  = embed[captions[b,t-1]] for t >= 1
    x_sc[0:B, :] = feat_ref[...]
    for t in range(1, T):                     # static Python loops (T, B small)
        for bb in range(B):
            tok = cap_ref[bb, t - 1]          # scalar read from SMEM
            r = t * B + bb
            x_sc[r:r + 1, :] = embed_ref[pl.ds(tok, 1), :]   # dynamic row gather

    # ---- (2) Hoisted input projection for ALL timesteps: one lane-dense matmul.
    gx_sc[...] = (jnp.dot(x_sc[...], w_ih_ref[...],
                          preferred_element_type=jnp.float32)
                  + b_ref[...])                            # (T*B, 4H)

    # ---- (3) Recurrence: only h @ w_hh + gate math on the serial path.
    def step(t, carry):
        h, c = carry
        base = pl.multiple_of(t * B, B)                    # sublane-aligned
        gates = gx_sc[pl.ds(base, B), :] + jnp.dot(
            h, w_hh_ref[...], preferred_element_type=jnp.float32)  # (B, 4H)
        # One full-width sigmoid + one full-width tanh (3 EUP pushes/step incl.
        # tanh(c)), then static lane slices in PyTorch gate order [i, f, g, o].
        sg = jax.nn.sigmoid(gates)
        tg = jnp.tanh(gates)
        i = sg[:, 0 * H:1 * H]
        f = sg[:, 1 * H:2 * H]
        g = tg[:, 2 * H:3 * H]
        o = sg[:, 3 * H:4 * H]
        c_new = f * c + i * g
        h_new = o * jnp.tanh(c_new)
        hs_sc[t] = h_new                                   # VMEM only (H < 128)
        return (h_new, c_new)

    h0 = jnp.zeros((B, H), jnp.float32)
    c0 = jnp.zeros((B, H), jnp.float32)
    jax.lax.fori_loop(0, T, step, (h0, c0), unroll=min(T, 8))

    # ---- (4) Batched fc projection: one lane-dense (T*B, H) @ (H, V) matmul,
    #          then distribute into the batch-first (B, T, V) output block
    #          with static-index VMEM stores (no transpose op anywhere).
    hs2 = hs_sc[...].reshape(T * B, H)
    out2d = (jnp.dot(hs2, fc_w_ref[...], preferred_element_type=jnp.float32)
             + fc_b_ref[...])                              # (T*B, V)
    for t in range(T):
        out_ref[:, t:t + 1, :] = out2d[t * B:(t + 1) * B, :].reshape(B, 1, V)


# --------------------------------------------------------------------------
# Full DecoderRNN forward: a single pallas_call, nothing else.
# --------------------------------------------------------------------------
def decoder_rnn_forward(features, captions, params):
    """features: (B, E) f32, captions: (B, S) int32 -> (B, S, V) f32."""
    B, S = captions.shape
    T = S
    E = features.shape[1]
    H = params["w_hh"].shape[0]
    G = 4 * H
    V = params["fc_w"].shape[1]

    return pl.pallas_call(
        fused_decoder_kernel,
        out_shape=jax.ShapeDtypeStruct((B, T, V), jnp.float32),
        grid_spec=pltpu.PrefetchScalarGridSpec(
            num_scalar_prefetch=1,               # captions -> SMEM
            grid=(1,),
            in_specs=[
                pl.BlockSpec((B, E), lambda i, cap: (0, 0)),    # features
                pl.BlockSpec((V, E), lambda i, cap: (0, 0)),    # embed table
                pl.BlockSpec((E, G), lambda i, cap: (0, 0)),    # w_ih
                pl.BlockSpec((H, G), lambda i, cap: (0, 0)),    # w_hh
                pl.BlockSpec((1, G), lambda i, cap: (0, 0)),    # b
                pl.BlockSpec((H, V), lambda i, cap: (0, 0)),    # fc_w
                pl.BlockSpec((1, V), lambda i, cap: (0, 0)),    # fc_b
            ],
            out_specs=pl.BlockSpec((B, T, V), lambda i, cap: (0, 0, 0)),
            scratch_shapes=[
                pltpu.VMEM((T * B, E), jnp.float32),   # x (gathered inputs)
                pltpu.VMEM((T * B, G), jnp.float32),   # gates_x
                pltpu.VMEM((T, B, H), jnp.float32),    # h_t history
            ],
        ),
        compiler_params=pltpu.CompilerParams(
            dimension_semantics=("arbitrary",)),
    )(captions, features, params["embed"], params["w_ih"], params["w_hh"],
      params["b"], params["fc_w"], params["fc_b"])


# --------------------------------------------------------------------------
# Pure-JAX reference (same semantics as the PyTorch forward).
# --------------------------------------------------------------------------
def reference_forward(features, captions, params):
    emb = jnp.take(params["embed"], captions[:, :-1], axis=0)
    x = jnp.concatenate([features[:, None, :], emb], axis=1)      # (B, T, E)
    H = params["w_hh"].shape[0]
    B = x.shape[0]

    def step(carry, xt):
        h, c = carry
        gates = xt @ params["w_ih"] + h @ params["w_hh"] + params["b"]
        i = jax.nn.sigmoid(gates[:, 0 * H:1 * H])
        f = jax.nn.sigmoid(gates[:, 1 * H:2 * H])
        g = jnp.tanh(gates[:, 2 * H:3 * H])
        o = jax.nn.sigmoid(gates[:, 3 * H:4 * H])
        c = f * c + i * g
        h = o * jnp.tanh(c)
        return (h, c), h

    init = (jnp.zeros((B, H), jnp.float32), jnp.zeros((B, H), jnp.float32))
    _, hs = jax.lax.scan(step, init, jnp.transpose(x, (1, 0, 2)))
    hs = jnp.transpose(hs, (1, 0, 2))                             # (B, T, H)
    return hs @ params["fc_w"] + params["fc_b"]


def init_params(key, embed_size, hidden_size, vocab_size):
    ks = jax.random.split(key, 7)
    s = 0.1
    embed = jax.random.normal(ks[0], (vocab_size, embed_size), jnp.float32) * s
    w_ih = jax.random.normal(ks[1], (embed_size, 4 * hidden_size), jnp.float32) * s
    w_hh = jax.random.normal(ks[2], (hidden_size, 4 * hidden_size), jnp.float32) * s
    b_ih = jax.random.normal(ks[3], (4 * hidden_size,), jnp.float32) * s
    b_hh = jax.random.normal(ks[4], (4 * hidden_size,), jnp.float32) * s
    fc_w = jax.random.normal(ks[5], (hidden_size, vocab_size), jnp.float32) * s
    fc_b = jax.random.normal(ks[6], (vocab_size,), jnp.float32) * s
    return {
        "embed": embed,
        "w_ih": w_ih,
        "w_hh": w_hh,
        "b": (b_ih + b_hh).reshape(1, 4 * hidden_size),
        "fc_w": fc_w,
        "fc_b": fc_b.reshape(1, vocab_size),
    }


if __name__ == "__main__":
    # TPU-friendly small shapes:
    #   B=8   -> fills the 8 f32 sublanes,
    #   V=128 -> lane-dense output stores / embed table rows,
    #   E=H=32 -> 4H = 128 = one full vreg of lanes,
    #   S=8   -> LSTM sequence length T = 8.
    B, E, H, V, S = 8, 32, 32, 128, 8

    key = jax.random.PRNGKey(0)
    pkey, fkey, ckey = jax.random.split(key, 3)

    params = init_params(pkey, E, H, V)
    features = jax.random.normal(fkey, (B, E), jnp.float32)
    captions = jax.random.randint(ckey, (B, S), 0, V, dtype=jnp.int32)

    out = decoder_rnn_forward(features, captions, params)
    out = jax.block_until_ready(out)
    assert out.shape == (B, S, V), out.shape

    ref = reference_forward(features, captions, params)
    assert jnp.allclose(out, ref, atol=1e-4, rtol=1e-4), "mismatch vs reference"

    print("KERNEL_OK")
</pallas_src>

<mosaic_0001>
module attributes {stable_mosaic.version = 11 : i64} {
  func.func @fused_decoder_kernel(%arg0: i32, %arg1: memref<8x8xi32, #tpu.memory_space<smem>>, %arg2: memref<8x32xf32, #tpu.memory_space<vmem>>, %arg3: memref<128x32xf32, #tpu.memory_space<vmem>>, %arg4: memref<32x128xf32, #tpu.memory_space<vmem>>, %arg5: memref<32x128xf32, #tpu.memory_space<vmem>>, %arg6: memref<1x128xf32, #tpu.memory_space<vmem>>, %arg7: memref<32x128xf32, #tpu.memory_space<vmem>>, %arg8: memref<1x128xf32, #tpu.memory_space<vmem>>, %arg9: memref<8x8x128xf32, #tpu.memory_space<vmem>>, %arg10: memref<64x32xf32, #tpu.memory_space<vmem>>, %arg11: memref<64x128xf32, #tpu.memory_space<vmem>>, %arg12: memref<8x8x32xf32, #tpu.memory_space<vmem>>) attributes {dimension_semantics = [#tpu.dimension_semantics<arbitrary>], iteration_bounds = array<i64: 1>, scalar_prefetch = 1 : i64, scratch_operands = 3 : i64, tpu.core_type = #tpu.core_type<tc>, window_params = [{pipeline_mode = #tpu.pipeline_mode<synchronous>, transform_indices = @transform_0, window_bounds = array<i64: 8, 32>}, {pipeline_mode = #tpu.pipeline_mode<synchronous>, transform_indices = @transform_1, window_bounds = array<i64: 128, 32>}, {pipeline_mode = #tpu.pipeline_mode<synchronous>, transform_indices = @transform_2, window_bounds = array<i64: 32, 128>}, {pipeline_mode = #tpu.pipeline_mode<synchronous>, transform_indices = @transform_3, window_bounds = array<i64: 32, 128>}, {pipeline_mode = #tpu.pipeline_mode<synchronous>, transform_indices = @transform_4, window_bounds = array<i64: 1, 128>}, {pipeline_mode = #tpu.pipeline_mode<synchronous>, transform_indices = @transform_5, window_bounds = array<i64: 32, 128>}, {pipeline_mode = #tpu.pipeline_mode<synchronous>, transform_indices = @transform_6, window_bounds = array<i64: 1, 128>}, {pipeline_mode = #tpu.pipeline_mode<synchronous>, transform_indices = @transform_7, window_bounds = array<i64: 8, 8, 128>}]} {
    %c0 = arith.constant 0 : index
    %c0_0 = arith.constant 0 : index
    %0 = vector.load %arg2[%c0, %c0_0] : memref<8x32xf32, #tpu.memory_space<vmem>>, vector<8x32xf32>
    %c0_1 = arith.constant 0 : index
    %c0_2 = arith.constant 0 : index
    %1 = vector.load %arg10[%c0_1, %c0_2] : memref<64x32xf32, #tpu.memory_space<vmem>>, vector<8x32xf32>
    tpu.vector_store %arg10[%c0_1, %c0_2], %0 {strides = array<i32>} : memref<64x32xf32, #tpu.memory_space<vmem>>, vector<8x32xf32>,
    %c0_3 = arith.constant 0 : index
    %c0_4 = arith.constant 0 : index
    %2 = memref.load %arg1[%c0_3, %c0_4] : memref<8x8xi32, #tpu.memory_space<smem>>
    %3 = arith.index_cast %2 : i32 to index
    %c0_5 = arith.constant 0 : index
    %4 = vector.load %arg3[%3, %c0_5] : memref<128x32xf32, #tpu.memory_space<vmem>>, vector<1x32xf32>
    %c8 = arith.constant 8 : index
    %c0_6 = arith.constant 0 : index
    %5 = vector.load %arg10[%c8, %c0_6] : memref<64x32xf32, #tpu.memory_space<vmem>>, vector<1x32xf32>
    tpu.vector_store %arg10[%c8, %c0_6], %4 {strides = array<i32>} : memref<64x32xf32, #tpu.memory_space<vmem>>, vector<1x32xf32>,
    %c1 = arith.constant 1 : index
    %c0_7 = arith.constant 0 : index
    %6 = memref.load %arg1[%c1, %c0_7] : memref<8x8xi32, #tpu.memory_space<smem>>
    %7 = arith.index_cast %6 : i32 to index
    %c0_8 = arith.constant 0 : index
    %8 = vector.load %arg3[%7, %c0_8] : memref<128x32xf32, #tpu.memory_space<vmem>>, vector<1x32xf32>
    %c9 = arith.constant 9 : index
    %c0_9 = arith.constant 0 : index
    %9 = vector.load %arg10[%c9, %c0_9] : memref<64x32xf32, #tpu.memory_space<vmem>>, vector<1x32xf32>
    tpu.vector_store %arg10[%c9, %c0_9], %8 {strides = array<i32>} : memref<64x32xf32, #tpu.memory_space<vmem>>, vector<1x32xf32>,
    %c2 = arith.constant 2 : index
    %c0_10 = arith.constant 0 : index
    %10 = memref.load %arg1[%c2, %c0_10] : memref<8x8xi32, #tpu.memory_space<smem>>
    %11 = arith.index_cast %10 : i32 to index
    %c0_11 = arith.constant 0 : index
    %12 = vector.load %arg3[%11, %c0_11] : memref<128x32xf32, #tpu.memory_space<vmem>>, vector<1x32xf32>
    %c10 = arith.constant 10 : index
    %c0_12 = arith.constant 0 : index
    %13 = vector.load %arg10[%c10, %c0_12] : memref<64x32xf32, #tpu.memory_space<vmem>>, vector<1x32xf32>
    tpu.vector_store %arg10[%c10, %c0_12], %12 {strides = array<i32>} : memref<64x32xf32, #tpu.memory_space<vmem>>, vector<1x32xf32>,
    %c3 = arith.constant 3 : index
    %c0_13 = arith.constant 0 : index
    %14 = memref.load %arg1[%c3, %c0_13] : memref<8x8xi32, #tpu.memory_space<smem>>
    %15 = arith.index_cast %14 : i32 to index
    %c0_14 = arith.constant 0 : index
    %16 = vector.load %arg3[%15, %c0_14] : memref<128x32xf32, #tpu.memory_space<vmem>>, vector<1x32xf32>
    %c11 = arith.constant 11 : index
    %c0_15 = arith.constant 0 : index
    %17 = vector.load %arg10[%c11, %c0_15] : memref<64x32xf32, #tpu.memory_space<vmem>>, vector<1x32xf32>
    tpu.vector_store %arg10[%c11, %c0_15], %16 {strides = array<i32>} : memref<64x32xf32, #tpu.memory_space<vmem>>, vector<1x32xf32>,
    %c4 = arith.constant 4 : index
    %c0_16 = arith.constant 0 : index
    %18 = memref.load %arg1[%c4, %c0_16] : memref<8x8xi32, #tpu.memory_space<smem>>
    %19 = arith.index_cast %18 : i32 to index
    %c0_17 = arith.constant 0 : index
    %20 = vector.load %arg3[%19, %c0_17] : memref<128x32xf32, #tpu.memory_space<vmem>>, vector<1x32xf32>
    %c12 = arith.constant 12 : index
    %c0_18 = arith.constant 0 : index
    %21 = vector.load %arg10[%c12, %c0_18] : memref<64x32xf32, #tpu.memory_space<vmem>>, vector<1x32xf32>
    tpu.vector_store %arg10[%c12, %c0_18], %20 {strides = array<i32>} : memref<64x32xf32, #tpu.memory_space<vmem>>, vector<1x32xf32>,
    %c5 = arith.constant 5 : index
    %c0_19 = arith.constant 0 : index
    %22 = memref.load %arg1[%c5, %c0_19] : memref<8x8xi32, #tpu.memory_space<smem>>
    %23 = arith.index_cast %22 : i32 to index
    %c0_20 = arith.constant 0 : index
    %24 = vector.load %arg3[%23, %c0_20] : memref<128x32xf32, #tpu.memory_space<vmem>>, vector<1x32xf32>
    %c13 = arith.constant 13 : index
    %c0_21 = arith.constant 0 : index
    %25 = vector.load %arg10[%c13, %c0_21] : memref<64x32xf32, #tpu.memory_space<vmem>>, vector<1x32xf32>
    tpu.vector_store %arg10[%c13, %c0_21], %24 {strides = array<i32>} : memref<64x32xf32, #tpu.memory_space<vmem>>, vector<1x32xf32>,
    %c6 = arith.constant 6 : index
    %c0_22 = arith.constant 0 : index
    %26 = memref.load %arg1[%c6, %c0_22] : memref<8x8xi32, #tpu.memory_space<smem>>
    %27 = arith.index_cast %26 : i32 to index
    %c0_23 = arith.constant 0 : index
    %28 = vector.load %arg3[%27, %c0_23] : memref<128x32xf32, #tpu.memory_space<vmem>>, vector<1x32xf32>
    %c14 = arith.constant 14 : index
    %c0_24 = arith.constant 0 : index
    %29 = vector.load %arg10[%c14, %c0_24] : memref<64x32xf32, #tpu.memory_space<vmem>>, vector<1x32xf32>
    tpu.vector_store %arg10[%c14, %c0_24], %28 {strides = array<i32>} : memref<64x32xf32, #tpu.memory_space<vmem>>, vector<1x32xf32>,
    %c7 = arith.constant 7 : index
    %c0_25 = arith.constant 0 : index
    %30 = memref.load %arg1[%c7, %c0_25] : memref<8x8xi32, #tpu.memory_space<smem>>
    %31 = arith.index_cast %30 : i32 to index
    %c0_26 = arith.constant 0 : index
    %32 = vector.load %arg3[%31, %c0_26] : memref<128x32xf32, #tpu.memory_space<vmem>>, vector<1x32xf32>
    %c15 = arith.constant 15 : index
    %c0_27 = arith.constant 0 : index
    %33 = vector.load %arg10[%c15, %c0_27] : memref<64x32xf32, #tpu.memory_space<vmem>>, vector<1x32xf32>
    tpu.vector_store %arg10[%c15, %c0_27], %32 {strides = array<i32>} : memref<64x32xf32, #tpu.memory_space<vmem>>, vector<1x32xf32>,
    %c0_28 = arith.constant 0 : index
    %c1_29 = arith.constant 1 : index
    %34 = memref.load %arg1[%c0_28, %c1_29] : memref<8x8xi32, #tpu.memory_space<smem>>
    %35 = arith.index_cast %34 : i32 to index
    %c0_30 = arith.constant 0 : index
    %36 = vector.load %arg3[%35, %c0_30] : memref<128x32xf32, #tpu.memory_space<vmem>>, vector<1x32xf32>
    %c16 = arith.constant 16 : index
    %c0_31 = arith.constant 0 : index
    %37 = vector.load %arg10[%c16, %c0_31] : memref<64x32xf32, #tpu.memory_space<vmem>>, vector<1x32xf32>
    tpu.vector_store %arg10[%c16, %c0_31], %36 {strides = array<i32>} : memref<64x32xf32, #tpu.memory_space<vmem>>, vector<1x32xf32>,
    %c1_32 = arith.constant 1 : index
    %c1_33 = arith.constant 1 : index
    %38 = memref.load %arg1[%c1_32, %c1_33] : memref<8x8xi32, #tpu.memory_space<smem>>
    %39 = arith.index_cast %38 : i32 to index
    %c0_34 = arith.constant 0 : index
    %40 = vector.load %arg3[%39, %c0_34] : memref<128x32xf32, #tpu.memory_space<vmem>>, vector<1x32xf32>
    %c17 = arith.constant 17 : index
    %c0_35 = arith.constant 0 : index
    %41 = vector.load %arg10[%c17, %c0_35] : memref<64x32xf32, #tpu.memory_space<vmem>>, vector<1x32xf32>
    tpu.vector_store %arg10[%c17, %c0_35], %40 {strides = array<i32>} : memref<64x32xf32, #tpu.memory_space<vmem>>, vector<1x32xf32>,
    %c2_36 = arith.constant 2 : index
    %c1_37 = arith.constant 1 : index
    %42 = memref.load %arg1[%c2_36, %c1_37] : memref<8x8xi32, #tpu.memory_space<smem>>
    %43 = arith.index_cast %42 : i32 to index
    %c0_38 = arith.constant 0 : index
    %44 = vector.load %arg3[%43, %c0_38] : memref<128x32xf32, #tpu.memory_space<vmem>>, vector<1x32xf32>
    %c18 = arith.constant 18 : index
    %c0_39 = arith.constant 0 : index
    %45 = vector.load %arg10[%c18, %c0_39] : memref<64x32xf32, #tpu.memory_space<vmem>>, vector<1x32xf32>
    tpu.vector_store %arg10[%c18, %c0_39], %44 {strides = array<i32>} : memref<64x32xf32, #tpu.memory_space<vmem>>, vector<1x32xf32>,
    %c3_40 = arith.constant 3 : index
    %c1_41 = arith.constant 1 : index
    %46 = memref.load %arg1[%c3_40, %c1_41] : memref<8x8xi32, #tpu.memory_space<smem>>
    %47 = arith.index_cast %46 : i32 to index
    %c0_42 = arith.constant 0 : index
    %48 = vector.load %arg3[%47, %c0_42] : memref<128x32xf32, #tpu.memory_space<vmem>>, vector<1x32xf32>
    %c19 = arith.constant 19 : index
    %c0_43 = arith.constant 0 : index
    %49 = vector.load %arg10[%c19, %c0_43] : memref<64x32xf32, #tpu.memory_space<vmem>>, vector<1x32xf32>
    tpu.vector_store %arg10[%c19, %c0_43], %48 {strides = array<i32>} : memref<64x32xf32, #tpu.memory_space<vmem>>, vector<1x32xf32>,
    %c4_44 = arith.constant 4 : index
    %c1_45 = arith.constant 1 : index
    %50 = memref.load %arg1[%c4_44, %c1_45] : memref<8x8xi32, #tpu.memory_space<smem>>
    %51 = arith.index_cast %50 : i32 to index
    %c0_46 = arith.constant 0 : index
    %52 = vector.load %arg3[%51, %c0_46] : memref<128x32xf32, #tpu.memory_space<vmem>>, vector<1x32xf32>
    %c20 = arith.constant 20 : index
    %c0_47 = arith.constant 0 : index
    %53 = vector.load %arg10[%c20, %c0_47] : memref<64x32xf32, #tpu.memory_space<vmem>>, vector<1x32xf32>
    tpu.vector_store %arg10[%c20, %c0_47], %52 {strides = array<i32>} : memref<64x32xf32, #tpu.memory_space<vmem>>, vector<1x32xf32>,
    %c5_48 = arith.constant 5 : index
    %c1_49 = arith.constant 1 : index
    %54 = memref.load %arg1[%c5_48, %c1_49] : memref<8x8xi32, #tpu.memory_space<smem>>
    %55 = arith.index_cast %54 : i32 to index
    %c0_50 = arith.constant 0 : index
    %56 = vector.load %arg3[%55, %c0_50] : memref<128x32xf32, #tpu.memory_space<vmem>>, vector<1x32xf32>
    %c21 = arith.constant 21 : index
    %c0_51 = arith.constant 0 : index
    %57 = vector.load %arg10[%c21, %c0_51] : memref<64x32xf32, #tpu.memory_space<vmem>>, vector<1x32xf32>
    tpu.vector_store %arg10[%c21, %c0_51], %56 {strides = array<i32>} : memref<64x32xf32, #tpu.memory_space<vmem>>, vector<1x32xf32>,
    %c6_52 = arith.constant 6 : index
    %c1_53 = arith.constant 1 : index
    %58 = memref.load %arg1[%c6_52, %c1_53] : memref<8x8xi32, #tpu.memory_space<smem>>
    %59 = arith.index_cast %58 : i32 to index
    %c0_54 = arith.constant 0 : index
    %60 = vector.load %arg3[%59, %c0_54] : memref<128x32xf32, #tpu.memory_space<vmem>>, vector<1x32xf32>
    %c22 = arith.constant 22 : index
    %c0_55 = arith.constant 0 : index
    %61 = vector.load %arg10[%c22, %c0_55] : memref<64x32xf32, #tpu.memory_space<vmem>>, vector<1x32xf32>
    tpu.vector_store %arg10[%c22, %c0_55], %60 {strides = array<i32>} : memref<64x32xf32, #tpu.memory_space<vmem>>, vector<1x32xf32>,
    %c7_56 = arith.constant 7 : index
    %c1_57 = arith.constant 1 : index
    %62 = memref.load %arg1[%c7_56, %c1_57] : memref<8x8xi32, #tpu.memory_space<smem>>
    %63 = arith.index_cast %62 : i32 to index
    %c0_58 = arith.constant 0 : index
    %64 = vector.load %arg3[%63, %c0_58] : memref<128x32xf32, #tpu.memory_space<vmem>>, vector<1x32xf32>
    %c23 = arith.constant 23 : index
    %c0_59 = arith.constant 0 : index
    %65 = vector.load %arg10[%c23, %c0_59] : memref<64x32xf32, #tpu.memory_space<vmem>>, vector<1x32xf32>
    tpu.vector_store %arg10[%c23, %c0_59], %64 {strides = array<i32>} : memref<64x32xf32, #tpu.memory_space<vmem>>, vector<1x32xf32>,
    %c0_60 = arith.constant 0 : index
    %c2_61 = arith.constant 2 : index
    %66 = memref.load %arg1[%c0_60, %c2_61] : memref<8x8xi32, #tpu.memory_space<smem>>
    %67 = arith.index_cast %66 : i32 to index
    %c0_62 = arith.constant 0 : index
    %68 = vector.load %arg3[%67, %c0_62] : memref<128x32xf32, #tpu.memory_space<vmem>>, vector<1x32xf32>
    %c24 = arith.constant 24 : index
    %c0_63 = arith.constant 0 : index
    %69 = vector.load %arg10[%c24, %c0_63] : memref<64x32xf32, #tpu.memory_space<vmem>>, vector<1x32xf32>
    tpu.vector_store %arg10[%c24, %c0_63], %68 {strides = array<i32>} : memref<64x32xf32, #tpu.memory_space<vmem>>, vector<1x32xf32>,
    %c1_64 = arith.constant 1 : index
    %c2_65 = arith.constant 2 : index
    %70 = memref.load %arg1[%c1_64, %c2_65] : memref<8x8xi32, #tpu.memory_space<smem>>
    %71 = arith.index_cast %70 : i32 to index
    %c0_66 = arith.constant 0 : index
    %72 = vector.load %arg3[%71, %c0_66] : memref<128x32xf32, #tpu.memory_space<vmem>>, vector<1x32xf32>
    %c25 = arith.constant 25 : index
    %c0_67 = arith.constant 0 : index
    %73 = vector.load %arg10[%c25, %c0_67] : memref<64x32xf32, #tpu.memory_space<vmem>>, vector<1x32xf32>
    tpu.vector_store %arg10[%c25, %c0_67], %72 {strides = array<i32>} : memref<64x32xf32, #tpu.memory_space<vmem>>, vector<1x32xf32>,
    %c2_68 = arith.constant 2 : index
    %c2_69 = arith.constant 2 : index
    %74 = memref.load %arg1[%c2_68, %c2_69] : memref<8x8xi32, #tpu.memory_space<smem>>
    %75 = arith.index_cast %74 : i32 to index
    %c0_70 = arith.constant 0 : index
    %76 = vector.load %arg3[%75, %c0_70] : memref<128x32xf32, #tpu.memory_space<vmem>>, vector<1x32xf32>
    %c26 = arith.constant 26 : index
    %c0_71 = arith.constant 0 : index
    %77 = vector.load %arg10[%c26, %c0_71] : memref<64x32xf32, #tpu.memory_space<vmem>>, vector<1x32xf32>
    tpu.vector_store %arg10[%c26, %c0_71], %76 {strides = array<i32>} : memref<64x32xf32, #tpu.memory_space<vmem>>, vector<1x32xf32>,
    %c3_72 = arith.constant 3 : index
    %c2_73 = arith.constant 2 : index
    %78 = memref.load %arg1[%c3_72, %c2_73] : memref<8x8xi32, #tpu.memory_space<smem>>
    %79 = arith.index_cast %78 : i32 to index
    %c0_74 = arith.constant 0 : index
    %80 = vector.load %arg3[%79, %c0_74] : memref<128x32xf32, #tpu.memory_space<vmem>>, vector<1x32xf32>
    %c27 = arith.constant 27 : index
    %c0_75 = arith.constant 0 : index
    %81 = vector.load %arg10[%c27, %c0_75] : memref<64x32xf32, #tpu.memory_space<vmem>>, vector<1x32xf32>
    tpu.vector_store %arg10[%c27, %c0_75], %80 {strides = array<i32>} : memref<64x32xf32, #tpu.memory_space<vmem>>, vector<1x32xf32>,
    %c4_76 = arith.constant 4 : index
    %c2_77 = arith.constant 2 : index
    %82 = memref.load %arg1[%c4_76, %c2_77] : memref<8x8xi32, #tpu.memory_space<smem>>
    %83 = arith.index_cast %82 : i32 to index
    %c0_78 = arith.constant 0 : index
    %84 = vector.load %arg3[%83, %c0_78] : memref<128x32xf32, #tpu.memory_space<vmem>>, vector<1x32xf32>
    %c28 = arith.constant 28 : index
    %c0_79 = arith.constant 0 : index
    %85 = vector.load %arg10[%c28, %c0_79] : memref<64x32xf32, #tpu.memory_space<vmem>>, vector<1x32xf32>
    tpu.vector_store %arg10[%c28, %c0_79], %84 {strides = array<i32>} : memref<64x32xf32, #tpu.memory_space<vmem>>, vector<1x32xf32>,
    %c5_80 = arith.constant 5 : index
    %c2_81 = arith.constant 2 : index
    %86 = memref.load %arg1[%c5_80, %c2_81] : memref<8x8xi32, #tpu.memory_space<smem>>
    %87 = arith.index_cast %86 : i32 to index
    %c0_82 = arith.constant 0 : index
    %88 = vector.load %arg3[%87, %c0_82] : memref<128x32xf32, #tpu.memory_space<vmem>>, vector<1x32xf32>
    %c29 = arith.constant 29 : index
    %c0_83 = arith.constant 0 : index
    %89 = vector.load %arg10[%c29, %c0_83] : memref<64x32xf32, #tpu.memory_space<vmem>>, vector<1x32xf32>
    tpu.vector_store %arg10[%c29, %c0_83], %88 {strides = array<i32>} : memref<64x32xf32, #tpu.memory_space<vmem>>, vector<1x32xf32>,
    %c6_84 = arith.constant 6 : index
    %c2_85 = arith.constant 2 : index
    %90 = memref.load %arg1[%c6_84, %c2_85] : memref<8x8xi32, #tpu.memory_space<smem>>
    %91 = arith.index_cast %90 : i32 to index
    %c0_86 = arith.constant 0 : index
    %92 = vector.load %arg3[%91, %c0_86] : memref<128x32xf32, #tpu.memory_space<vmem>>, vector<1x32xf32>
    %c30 = arith.constant 30 : index
    %c0_87 = arith.constant 0 : index
    %93 = vector.load %arg10[%c30, %c0_87] : memref<64x32xf32, #tpu.memory_space<vmem>>, vector<1x32xf32>
    tpu.vector_store %arg10[%c30, %c0_87], %92 {strides = array<i32>} : memref<64x32xf32, #tpu.memory_space<vmem>>, vector<1x32xf32>,
    %c7_88 = arith.constant 7 : index
    %c2_89 = arith.constant 2 : index
    %94 = memref.load %arg1[%c7_88, %c2_89] : memref<8x8xi32, #tpu.memory_space<smem>>
    %95 = arith.index_cast %94 : i32 to index
    %c0_90 = arith.constant 0 : index
    %96 = vector.load %arg3[%95, %c0_90] : memref<128x32xf32, #tpu.memory_space<vmem>>, vector<1x32xf32>
    %c31 = arith.constant 31 : index
    %c0_91 = arith.constant 0 : index
    %97 = vector.load %arg10[%c31, %c0_91] : memref<64x32xf32, #tpu.memory_space<vmem>>, vector<1x32xf32>
    tpu.vector_store %arg10[%c31, %c0_91], %96 {strides = array<i32>} : memref<64x32xf32, #tpu.memory_space<vmem>>, vector<1x32xf32>,
    %c0_92 = arith.constant 0 : index
    %c3_93 = arith.constant 3 : index
    %98 = memref.load %arg1[%c0_92, %c3_93] : memref<8x8xi32, #tpu.memory_space<smem>>
    %99 = arith.index_cast %98 : i32 to index
    %c0_94 = arith.constant 0 : index
    %100 = vector.load %arg3[%99, %c0_94] : memref<128x32xf32, #tpu.memory_space<vmem>>, vector<1x32xf32>
    %c32 = arith.constant 32 : index
    %c0_95 = arith.constant 0 : index
    %101 = vector.load %arg10[%c32, %c0_95] : memref<64x32xf32, #tpu.memory_space<vmem>>, vector<1x32xf32>
    tpu.vector_store %arg10[%c32, %c0_95], %100 {strides = array<i32>} : memref<64x32xf32, #tpu.memory_space<vmem>>, vector<1x32xf32>,
    %c1_96 = arith.constant 1 : index
    %c3_97 = arith.constant 3 : index
    %102 = memref.load %arg1[%c1_96, %c3_97] : memref<8x8xi32, #tpu.memory_space<smem>>
    %103 = arith.index_cast %102 : i32 to index
    %c0_98 = arith.constant 0 : index
    %104 = vector.load %arg3[%103, %c0_98] : memref<128x32xf32, #tpu.memory_space<vmem>>, vector<1x32xf32>
    %c33 = arith.constant 33 : index
    %c0_99 = arith.constant 0 : index
    %105 = vector.load %arg10[%c33, %c0_99] : memref<64x32xf32, #tpu.memory_space<vmem>>, vector<1x32xf32>
    tpu.vector_store %arg10[%c33, %c0_99], %104 {strides = array<i32>} : memref<64x32xf32, #tpu.memory_space<vmem>>, vector<1x32xf32>,
    %c2_100 = arith.constant 2 : index
    %c3_101 = arith.constant 3 : index
    %106 = memref.load %arg1[%c2_100, %c3_101] : memref<8x8xi32, #tpu.memory_space<smem>>
    %107 = arith.index_cast %106 : i32 to index
    %c0_102 = arith.constant 0 : index
    %108 = vector.load %arg3[%107, %c0_102] : memref<128x32xf32, #tpu.memory_space<vmem>>, vector<1x32xf32>
    %c34 = arith.constant 34 : index
    %c0_103 = arith.constant 0 : index
    %109 = vector.load %arg10[%c34, %c0_103] : memref<64x32xf32, #tpu.memory_space<vmem>>, vector<1x32xf32>
    tpu.vector_store %arg10[%c34, %c0_103], %108 {strides = array<i32>} : memref<64x32xf32, #tpu.memory_space<vmem>>, vector<1x32xf32>,
    %c3_104 = arith.constant 3 : index
    %c3_105 = arith.constant 3 : index
    %110 = memref.load %arg1[%c3_104, %c3_105] : memref<8x8xi32, #tpu.memory_space<smem>>
    %111 = arith.index_cast %110 : i32 to index
    %c0_106 = arith.constant 0 : index
    %112 = vector.load %arg3[%111, %c0_106] : memref<128x32xf32, #tpu.memory_space<vmem>>, vector<1x32xf32>
    %c35 = arith.constant 35 : index
    %c0_107 = arith.constant 0 : index
    %113 = vector.load %arg10[%c35, %c0_107] : memref<64x32xf32, #tpu.memory_space<vmem>>, vector<1x32xf32>
    tpu.vector_store %arg10[%c35, %c0_107], %112 {strides = array<i32>} : memref<64x32xf32, #tpu.memory_space<vmem>>, vector<1x32xf32>,
    %c4_108 = arith.constant 4 : index
    %c3_109 = arith.constant 3 : index
    %114 = memref.load %arg1[%c4_108, %c3_109] : memref<8x8xi32, #tpu.memory_space<smem>>
    %115 = arith.index_cast %114 : i32 to index
    %c0_110 = arith.constant 0 : index
    %116 = vector.load %arg3[%115, %c0_110] : memref<128x32xf32, #tpu.memory_space<vmem>>, vector<1x32xf32>
    %c36 = arith.constant 36 : index
    %c0_111 = arith.constant 0 : index
    %117 = vector.load %arg10[%c36, %c0_111] : memref<64x32xf32, #tpu.memory_space<vmem>>, vector<1x32xf32>
    tpu.vector_store %arg10[%c36, %c0_111], %116 {strides = array<i32>} : memref<64x32xf32, #tpu.memory_space<vmem>>, vector<1x32xf32>,
    %c5_112 = arith.constant 5 : index
    %c3_113 = arith.constant 3 : index
    %118 = memref.load %arg1[%c5_112, %c3_113] : memref<8x8xi32, #tpu.memory_space<smem>>
    %119 = arith.index_cast %118 : i32 to index
    %c0_114 = arith.constant 0 : index
    %120 = vector.load %arg3[%119, %c0_114] : memref<128x32xf32, #tpu.memory_space<vmem>>, vector<1x32xf32>
    %c37 = arith.constant 37 : index
    %c0_115 = arith.constant 0 : index
    %121 = vector.load %arg10[%c37, %c0_115] : memref<64x32xf32, #tpu.memory_space<vmem>>, vector<1x32xf32>
    tpu.vector_store %arg10[%c37, %c0_115], %120 {strides = array<i32>} : memref<64x32xf32, #tpu.memory_space<vmem>>, vector<1x32xf32>,
    %c6_116 = arith.constant 6 : index
    %c3_117 = arith.constant 3 : index
    %122 = memref.load %arg1[%c6_116, %c3_117] : memref<8x8xi32, #tpu.memory_space<smem>>
    %123 = arith.index_cast %122 : i32 to index
    %c0_118 = arith.constant 0 : index
    %124 = vector.load %arg3[%123, %c0_118] : memref<128x32xf32, #tpu.memory_space<vmem>>, vector<1x32xf32>
    %c38 = arith.constant 38 : index
    %c0_119 = arith.constant 0 : index
    %125 = vector.load %arg10[%c38, %c0_119] : memref<64x32xf32, #tpu.memory_space<vmem>>, vector<1x32xf32>
    tpu.vector_store %arg10[%c38, %c0_119], %124 {strides = array<i32>} : memref<64x32xf32, #tpu.memory_space<vmem>>, vector<1x32xf32>,
    %c7_120 = arith.constant 7 : index
    %c3_121 = arith.constant 3 : index
    %126 = memref.load %arg1[%c7_120, %c3_121] : memref<8x8xi32, #tpu.memory_space<smem>>
    %127 = arith.index_cast %126 : i32 to index
    %c0_122 = arith.constant 0 : index
    %128 = vector.load %arg3[%127, %c0_122] : memref<128x32xf32, #tpu.memory_space<vmem>>, vector<1x32xf32>
    %c39 = arith.constant 39 : index
    %c0_123 = arith.constant 0 : index
    %129 = vector.load %arg10[%c39, %c0_123] : memref<64x32xf32, #tpu.memory_space<vmem>>, vector<1x32xf32>
    tpu.vector_store %arg10[%c39, %c0_123], %128 {strides = array<i32>} : memref<64x32xf32, #tpu.memory_space<vmem>>, vector<1x32xf32>,
    %c0_124 = arith.constant 0 : index
    %c4_125 = arith.constant 4 : index
    %130 = memref.load %arg1[%c0_124, %c4_125] : memref<8x8xi32, #tpu.memory_space<smem>>
    %131 = arith.index_cast %130 : i32 to index
    %c0_126 = arith.constant 0 : index
    %132 = vector.load %arg3[%131, %c0_126] : memref<128x32xf32, #tpu.memory_space<vmem>>, vector<1x32xf32>
    %c40 = arith.constant 40 : index
    %c0_127 = arith.constant 0 : index
    %133 = vector.load %arg10[%c40, %c0_127] : memref<64x32xf32, #tpu.memory_space<vmem>>, vector<1x32xf32>
    tpu.vector_store %arg10[%c40, %c0_127], %132 {strides = array<i32>} : memref<64x32xf32, #tpu.memory_space<vmem>>, vector<1x32xf32>,
    %c1_128 = arith.constant 1 : index
    %c4_129 = arith.constant 4 : index
    %134 = memref.load %arg1[%c1_128, %c4_129] : memref<8x8xi32, #tpu.memory_space<smem>>
    %135 = arith.index_cast %134 : i32 to index
    %c0_130 = arith.constant 0 : index
    %136 = vector.load %arg3[%135, %c0_130] : memref<128x32xf32, #tpu.memory_space<vmem>>, vector<1x32xf32>
    %c41 = arith.constant 41 : index
    %c0_131 = arith.constant 0 : index
    %137 = vector.load %arg10[%c41, %c0_131] : memref<64x32xf32, #tpu.memory_space<vmem>>, vector<1x32xf32>
    tpu.vector_store %arg10[%c41, %c0_131], %136 {strides = array<i32>} : memref<64x32xf32, #tpu.memory_space<vmem>>, vector<1x32xf32>,
    %c2_132 = arith.constant 2 : index
    %c4_133 = arith.constant 4 : index
    %138 = memref.load %arg1[%c2_132, %c4_133] : memref<8x8xi32, #tpu.memory_space<smem>>
    %139 = arith.index_cast %138 : i32 to index
    %c0_134 = arith.constant 0 : index
    %140 = vector.load %arg3[%139, %c0_134] : memref<128x32xf32, #tpu.memory_space<vmem>>, vector<1x32xf32>
    %c42 = arith.constant 42 : index
    %c0_135 = arith.constant 0 : index
    %141 = vector.load %arg10[%c42, %c0_135] : memref<64x32xf32, #tpu.memory_space<vmem>>, vector<1x32xf32>
    tpu.vector_store %arg10[%c42, %c0_135], %140 {strides = array<i32>} : memref<64x32xf32, #tpu.memory_space<vmem>>, vector<1x32xf32>,
    %c3_136 = arith.constant 3 : index
    %c4_137 = arith.constant 4 : index
    %142 = memref.load %arg1[%c3_136, %c4_137] : memref<8x8xi32, #tpu.memory_space<smem>>
    %143 = arith.index_cast %142 : i32 to index
    %c0_138 = arith.constant 0 : index
    %144 = vector.load %arg3[%143, %c0_138] : memref<128x32xf32, #tpu.memory_space<vmem>>, vector<1x32xf32>
    %c43 = arith.constant 43 : index
    %c0_139 = arith.constant 0 : index
    %145 = vector.load %arg10[%c43, %c0_139] : memref<64x32xf32, #tpu.memory_space<vmem>>, vector<1x32xf32>
    tpu.vector_store %arg10[%c43, %c0_139], %144 {strides = array<i32>} : memref<64x32xf32, #tpu.memory_space<vmem>>, vector<1x32xf32>,
    %c4_140 = arith.constant 4 : index
    %c4_141 = arith.constant 4 : index
    %146 = memref.load %arg1[%c4_140, %c4_141] : memref<8x8xi32, #tpu.memory_space<smem>>
    %147 = arith.index_cast %146 : i32 to index
    %c0_142 = arith.constant 0 : index
    %148 = vector.load %arg3[%147, %c0_142] : memref<128x32xf32, #tpu.memory_space<vmem>>, vector<1x32xf32>
    %c44 = arith.constant 44 : index
    %c0_143 = arith.constant 0 : index
    %149 = vector.load %arg10[%c44, %c0_143] : memref<64x32xf32, #tpu.memory_space<vmem>>, vector<1x32xf32>
    tpu.vector_store %arg10[%c44, %c0_143], %148 {strides = array<i32>} : memref<64x32xf32, #tpu.memory_space<vmem>>, vector<1x32xf32>,
    %c5_144 = arith.constant 5 : index
    %c4_145 = arith.constant 4 : index
    %150 = memref.load %arg1[%c5_144, %c4_145] : memref<8x8xi32, #tpu.memory_space<smem>>
    %151 = arith.index_cast %150 : i32 to index
    %c0_146 = arith.constant 0 : index
    %152 = vector.load %arg3[%151, %c0_146] : memref<128x32xf32, #tpu.memory_space<vmem>>, vector<1x32xf32>
    %c45 = arith.constant 45 : index
    %c0_147 = arith.constant 0 : index
    %153 = vector.load %arg10[%c45, %c0_147] : memref<64x32xf32, #tpu.memory_space<vmem>>, vector<1x32xf32>
    tpu.vector_store %arg10[%c45, %c0_147], %152 {strides = array<i32>} : memref<64x32xf32, #tpu.memory_space<vmem>>, vector<1x32xf32>,
    %c6_148 = arith.constant 6 : index
    %c4_149 = arith.constant 4 : index
    %154 = memref.load %arg1[%c6_148, %c4_149] : memref<8x8xi32, #tpu.memory_space<smem>>
    %155 = arith.index_cast %154 : i32 to index
    %c0_150 = arith.constant 0 : index
    %156 = vector.load %arg3[%155, %c0_150] : memref<128x32xf32, #tpu.memory_space<vmem>>, vector<1x32xf32>
    %c46 = arith.constant 46 : index
    %c0_151 = arith.constant 0 : index
    %157 = vector.load %arg10[%c46, %c0_151] : memref<64x32xf32, #tpu.memory_space<vmem>>, vector<1x32xf32>
    tpu.vector_store %arg10[%c46, %c0_151], %156 {strides = array<i32>} : memref<64x32xf32, #tpu.memory_space<vmem>>, vector<1x32xf32>,
    %c7_152 = arith.constant 7 : index
    %c4_153 = arith.constant 4 : index
    %158 = memref.load %arg1[%c7_152, %c4_153] : memref<8x8xi32, #tpu.memory_space<smem>>
    %159 = arith.index_cast %158 : i32 to index
    %c0_154 = arith.constant 0 : index
    %160 = vector.load %arg3[%159, %c0_154] : memref<128x32xf32, #tpu.memory_space<vmem>>, vector<1x32xf32>
    %c47 = arith.constant 47 : index
    %c0_155 = arith.constant 0 : index
    %161 = vector.load %arg10[%c47, %c0_155] : memref<64x32xf32, #tpu.memory_space<vmem>>, vector<1x32xf32>
    tpu.vector_store %arg10[%c47, %c0_155], %160 {strides = array<i32>} : memref<64x32xf32, #tpu.memory_space<vmem>>, vector<1x32xf32>,
    %c0_156 = arith.constant 0 : index
    %c5_157 = arith.constant 5 : index
    %162 = memref.load %arg1[%c0_156, %c5_157] : memref<8x8xi32, #tpu.memory_space<smem>>
    %163 = arith.index_cast %162 : i32 to index
    %c0_158 = arith.constant 0 : index
    %164 = vector.load %arg3[%163, %c0_158] : memref<128x32xf32, #tpu.memory_space<vmem>>, vector<1x32xf32>
    %c48 = arith.constant 48 : index
    %c0_159 = arith.constant 0 : index
    %165 = vector.load %arg10[%c48, %c0_159] : memref<64x32xf32, #tpu.memory_space<vmem>>, vector<1x32xf32>
    tpu.vector_store %arg10[%c48, %c0_159], %164 {strides = array<i32>} : memref<64x32xf32, #tpu.memory_space<vmem>>, vector<1x32xf32>,
    %c1_160 = arith.constant 1 : index
    %c5_161 = arith.constant 5 : index
    %166 = memref.load %arg1[%c1_160, %c5_161] : memref<8x8xi32, #tpu.memory_space<smem>>
    %167 = arith.index_cast %166 : i32 to index
    %c0_162 = arith.constant 0 : index
    %168 = vector.load %arg3[%167, %c0_162] : memref<128x32xf32, #tpu.memory_space<vmem>>, vector<1x32xf32>
    %c49 = arith.constant 49 : index
    %c0_163 = arith.constant 0 : index
    %169 = vector.load %arg10[%c49, %c0_163] : memref<64x32xf32, #tpu.memory_space<vmem>>, vector<1x32xf32>
    tpu.vector_store %arg10[%c49, %c0_163], %168 {strides = array<i32>} : memref<64x32xf32, #tpu.memory_space<vmem>>, vector<1x32xf32>,
    %c2_164 = arith.constant 2 : index
    %c5_165 = arith.constant 5 : index
    %170 = memref.load %arg1[%c2_164, %c5_165] : memref<8x8xi32, #tpu.memory_space<smem>>
    %171 = arith.index_cast %170 : i32 to index
    %c0_166 = arith.constant 0 : index
    %172 = vector.load %arg3[%171, %c0_166] : memref<128x32xf32, #tpu.memory_space<vmem>>, vector<1x32xf32>
    %c50 = arith.constant 50 : index
    %c0_167 = arith.constant 0 : index
    %173 = vector.load %arg10[%c50, %c0_167] : memref<64x32xf32, #tpu.memory_space<vmem>>, vector<1x32xf32>
    tpu.vector_store %arg10[%c50, %c0_167], %172 {strides = array<i32>} : memref<64x32xf32, #tpu.memory_space<vmem>>, vector<1x32xf32>,
    %c3_168 = arith.constant 3 : index
    %c5_169 = arith.constant 5 : index
    %174 = memref.load %arg1[%c3_168, %c5_169] : memref<8x8xi32, #tpu.memory_space<smem>>
    %175 = arith.index_cast %174 : i32 to index
    %c0_170 = arith.constant 0 : index
    %176 = vector.load %arg3[%175, %c0_170] : memref<128x32xf32, #tpu.memory_space<vmem>>, vector<1x32xf32>
    %c51 = arith.constant 51 : index
    %c0_171 = arith.constant 0 : index
    %177 = vector.load %arg10[%c51, %c0_171] : memref<64x32xf32, #tpu.memory_space<vmem>>, vector<1x32xf32>
    tpu.vector_store %arg10[%c51, %c0_171], %176 {strides = array<i32>} : memref<64x32xf32, #tpu.memory_space<vmem>>, vector<1x32xf32>,
    %c4_172 = arith.constant 4 : index
    %c5_173 = arith.constant 5 : index
    %178 = memref.load %arg1[%c4_172, %c5_173] : memref<8x8xi32, #tpu.memory_space<smem>>
    %179 = arith.index_cast %178 : i32 to index
    %c0_174 = arith.constant 0 : index
    %180 = vector.load %arg3[%179, %c0_174] : memref<128x32xf32, #tpu.memory_space<vmem>>, vector<1x32xf32>
    %c52 = arith.constant 52 : index
    %c0_175 = arith.constant 0 : index
    %181 = vector.load %arg10[%c52, %c0_175] : memref<64x32xf32, #tpu.memory_space<vmem>>, vector<1x32xf32>
    tpu.vector_store %arg10[%c52, %c0_175], %180 {strides = array<i32>} : memref<64x32xf32, #tpu.memory_space<vmem>>, vector<1x32xf32>,
    %c5_176 = arith.constant 5 : index
    %c5_177 = arith.constant 5 : index
    %182 = memref.load %arg1[%c5_176, %c5_177] : memref<8x8xi32, #tpu.memory_space<smem>>
    %183 = arith.index_cast %182 : i32 to index
    %c0_178 = arith.constant 0 : index
    %184 = vector.load %arg3[%183, %c0_178] : memref<128x32xf32, #tpu.memory_space<vmem>>, vector<1x32xf32>
    %c53 = arith.constant 53 : index
    %c0_179 = arith.constant 0 : index
    %185 = vector.load %arg10[%c53, %c0_179] : memref<64x32xf32, #tpu.memory_space<vmem>>, vector<1x32xf32>
    tpu.vector_store %arg10[%c53, %c0_179], %184 {strides = array<i32>} : memref<64x32xf32, #tpu.memory_space<vmem>>, vector<1x32xf32>,
    %c6_180 = arith.constant 6 : index
    %c5_181 = arith.constant 5 : index
    %186 = memref.load %arg1[%c6_180, %c5_181] : memref<8x8xi32, #tpu.memory_space<smem>>
    %187 = arith.index_cast %186 : i32 to index
    %c0_182 = arith.constant 0 : index
    %188 = vector.load %arg3[%187, %c0_182] : memref<128x32xf32, #tpu.memory_space<vmem>>, vector<1x32xf32>
    %c54 = arith.constant 54 : index
    %c0_183 = arith.constant 0 : index
    %189 = vector.load %arg10[%c54, %c0_183] : memref<64x32xf32, #tpu.memory_space<vmem>>, vector<1x32xf32>
    tpu.vector_store %arg10[%c54, %c0_183], %188 {strides = array<i32>} : memref<64x32xf32, #tpu.memory_space<vmem>>, vector<1x32xf32>,
    %c7_184 = arith.constant 7 : index
    %c5_185 = arith.constant 5 : index
    %190 = memref.load %arg1[%c7_184, %c5_185] : memref<8x8xi32, #tpu.memory_space<smem>>
    %191 = arith.index_cast %190 : i32 to index
    %c0_186 = arith.constant 0 : index
    %192 = vector.load %arg3[%191, %c0_186] : memref<128x32xf32, #tpu.memory_space<vmem>>, vector<1x32xf32>
    %c55 = arith.constant 55 : index
    %c0_187 = arith.constant 0 : index
    %193 = vector.load %arg10[%c55, %c0_187] : memref<64x32xf32, #tpu.memory_space<vmem>>, vector<1x32xf32>
    tpu.vector_store %arg10[%c55, %c0_187], %192 {strides = array<i32>} : memref<64x32xf32, #tpu.memory_space<vmem>>, vector<1x32xf32>,
    %c0_188 = arith.constant 0 : index
    %c6_189 = arith.constant 6 : index
    %194 = memref.load %arg1[%c0_188, %c6_189] : memref<8x8xi32, #tpu.memory_space<smem>>
    %195 = arith.index_cast %194 : i32 to index
    %c0_190 = arith.constant 0 : index
    %196 = vector.load %arg3[%195, %c0_190] : memref<128x32xf32, #tpu.memory_space<vmem>>, vector<1x32xf32>
    %c56 = arith.constant 56 : index
    %c0_191 = arith.constant 0 : index
    %197 = vector.load %arg10[%c56, %c0_191] : memref<64x32xf32, #tpu.memory_space<vmem>>, vector<1x32xf32>
    tpu.vector_store %arg10[%c56, %c0_191], %196 {strides = array<i32>} : memref<64x32xf32, #tpu.memory_space<vmem>>, vector<1x32xf32>,
    %c1_192 = arith.constant 1 : index
    %c6_193 = arith.constant 6 : index
    %198 = memref.load %arg1[%c1_192, %c6_193] : memref<8x8xi32, #tpu.memory_space<smem>>
    %199 = arith.index_cast %198 : i32 to index
    %c0_194 = arith.constant 0 : index
    %200 = vector.load %arg3[%199, %c0_194] : memref<128x32xf32, #tpu.memory_space<vmem>>, vector<1x32xf32>
    %c57 = arith.constant 57 : index
    %c0_195 = arith.constant 0 : index
    %201 = vector.load %arg10[%c57, %c0_195] : memref<64x32xf32, #tpu.memory_space<vmem>>, vector<1x32xf32>
    tpu.vector_store %arg10[%c57, %c0_195], %200 {strides = array<i32>} : memref<64x32xf32, #tpu.memory_space<vmem>>, vector<1x32xf32>,
    %c2_196 = arith.constant 2 : index
    %c6_197 = arith.constant 6 : index
    %202 = memref.load %arg1[%c2_196, %c6_197] : memref<8x8xi32, #tpu.memory_space<smem>>
    %203 = arith.index_cast %202 : i32 to index
    %c0_198 = arith.constant 0 : index
    %204 = vector.load %arg3[%203, %c0_198] : memref<128x32xf32, #tpu.memory_space<vmem>>, vector<1x32xf32>
    %c58 = arith.constant 58 : index
    %c0_199 = arith.constant 0 : index
    %205 = vector.load %arg10[%c58, %c0_199] : memref<64x32xf32, #tpu.memory_space<vmem>>, vector<1x32xf32>
    tpu.vector_store %arg10[%c58, %c0_199], %204 {strides = array<i32>} : memref<64x32xf32, #tpu.memory_space<vmem>>, vector<1x32xf32>,
    %c3_200 = arith.constant 3 : index
    %c6_201 = arith.constant 6 : index
    %206 = memref.load %arg1[%c3_200, %c6_201] : memref<8x8xi32, #tpu.memory_space<smem>>
    %207 = arith.index_cast %206 : i32 to index
    %c0_202 = arith.constant 0 : index
    %208 = vector.load %arg3[%207, %c0_202] : memref<128x32xf32, #tpu.memory_space<vmem>>, vector<1x32xf32>
    %c59 = arith.constant 59 : index
    %c0_203 = arith.constant 0 : index
    %209 = vector.load %arg10[%c59, %c0_203] : memref<64x32xf32, #tpu.memory_space<vmem>>, vector<1x32xf32>
    tpu.vector_store %arg10[%c59, %c0_203], %208 {strides = array<i32>} : memref<64x32xf32, #tpu.memory_space<vmem>>, vector<1x32xf32>,
    %c4_204 = arith.constant 4 : index
    %c6_205 = arith.constant 6 : index
    %210 = memref.load %arg1[%c4_204, %c6_205] : memref<8x8xi32, #tpu.memory_space<smem>>
    %211 = arith.index_cast %210 : i32 to index
    %c0_206 = arith.constant 0 : index
    %212 = vector.load %arg3[%211, %c0_206] : memref<128x32xf32, #tpu.memory_space<vmem>>, vector<1x32xf32>
    %c60 = arith.constant 60 : index
    %c0_207 = arith.constant 0 : index
    %213 = vector.load %arg10[%c60, %c0_207] : memref<64x32xf32, #tpu.memory_space<vmem>>, vector<1x32xf32>
    tpu.vector_store %arg10[%c60, %c0_207], %212 {strides = array<i32>} : memref<64x32xf32, #tpu.memory_space<vmem>>, vector<1x32xf32>,
    %c5_208 = arith.constant 5 : index
    %c6_209 = arith.constant 6 : index
    %214 = memref.load %arg1[%c5_208, %c6_209] : memref<8x8xi32, #tpu.memory_space<smem>>
    %215 = arith.index_cast %214 : i32 to index
    %c0_210 = arith.constant 0 : index
    %216 = vector.load %arg3[%215, %c0_210] : memref<128x32xf32, #tpu.memory_space<vmem>>, vector<1x32xf32>
    %c61 = arith.constant 61 : index
    %c0_211 = arith.constant 0 : index
    %217 = vector.load %arg10[%c61, %c0_211] : memref<64x32xf32, #tpu.memory_space<vmem>>, vector<1x32xf32>
    tpu.vector_store %arg10[%c61, %c0_211], %216 {strides = array<i32>} : memref<64x32xf32, #tpu.memory_space<vmem>>, vector<1x32xf32>,
    %c6_212 = arith.constant 6 : index
    %c6_213 = arith.constant 6 : index
    %218 = memref.load %arg1[%c6_212, %c6_213] : memref<8x8xi32, #tpu.memory_space<smem>>
    %219 = arith.index_cast %218 : i32 to index
    %c0_214 = arith.constant 0 : index
    %220 = vector.load %arg3[%219, %c0_214] : memref<128x32xf32, #tpu.memory_space<vmem>>, vector<1x32xf32>
    %c62 = arith.constant 62 : index
    %c0_215 = arith.constant 0 : index
    %221 = vector.load %arg10[%c62, %c0_215] : memref<64x32xf32, #tpu.memory_space<vmem>>, vector<1x32xf32>
    tpu.vector_store %arg10[%c62, %c0_215], %220 {strides = array<i32>} : memref<64x32xf32, #tpu.memory_space<vmem>>, vector<1x32xf32>,
    %c7_216 = arith.constant 7 : index
    %c6_217 = arith.constant 6 : index
    %222 = memref.load %arg1[%c7_216, %c6_217] : memref<8x8xi32, #tpu.memory_space<smem>>
    %223 = arith.index_cast %222 : i32 to index
    %c0_218 = arith.constant 0 : index
    %224 = vector.load %arg3[%223, %c0_218] : memref<128x32xf32, #tpu.memory_space<vmem>>, vector<1x32xf32>
    %c63 = arith.constant 63 : index
    %c0_219 = arith.constant 0 : index
    %225 = vector.load %arg10[%c63, %c0_219] : memref<64x32xf32, #tpu.memory_space<vmem>>, vector<1x32xf32>
    tpu.vector_store %arg10[%c63, %c0_219], %224 {strides = array<i32>} : memref<64x32xf32, #tpu.memory_space<vmem>>, vector<1x32xf32>,
    %c0_220 = arith.constant 0 : index
    %c0_221 = arith.constant 0 : index
    %226 = vector.load %arg10[%c0_220, %c0_221] : memref<64x32xf32, #tpu.memory_space<vmem>>, vector<64x32xf32>
    %c0_222 = arith.constant 0 : index
    %c0_223 = arith.constant 0 : index
    %227 = vector.load %arg4[%c0_222, %c0_223] : memref<32x128xf32, #tpu.memory_space<vmem>>, vector<32x128xf32>
    %cst = arith.constant dense<0.000000e+00> : vector<64x128xf32>
    %228 = tpu.matmul %226, %227, %cst {dimension_numbers = #tpu.dot_dimension_numbers<[1], [0], [0], [1], [0, 0, 1, 1], [], []>} : vector<64x32xf32>, vector<32x128xf32>, vector<64x128xf32> -> vector<64x128xf32>
    %c0_224 = arith.constant 0 : index
    %c0_225 = arith.constant 0 : index
    %229 = vector.load %arg6[%c0_224, %c0_225] : memref<1x128xf32, #tpu.memory_space<vmem>>, vector<1x128xf32>
    %230 = vector.broadcast %229 : vector<1x128xf32> to vector<64x128xf32>
    %231 = arith.addf %228, %230 : vector<64x128xf32>
    %c0_226 = arith.constant 0 : index
    %c0_227 = arith.constant 0 : index
    %232 = vector.load %arg11[%c0_226, %c0_227] : memref<64x128xf32, #tpu.memory_space<vmem>>, vector<64x128xf32>
    tpu.vector_store %arg11[%c0_226, %c0_227], %231 {strides = array<i32>} : memref<64x128xf32, #tpu.memory_space<vmem>>, vector<64x128xf32>,
    %cst_228 = arith.constant 0.000000e+00 : f32
    %233 = vector.broadcast %cst_228 : f32 to vector<8x32xf32>
    %cst_229 = arith.constant 0.000000e+00 : f32
    %234 = vector.broadcast %cst_229 : f32 to vector<8x32xf32>
    %c0_i32 = arith.constant 0 : i32
    %c8_i32 = arith.constant 8 : i32
    %235 = arith.muli %c0_i32, %c8_i32 : i32
    %236 = tpu.assume_multiple %235, 8 : i32
    %237 = arith.index_cast %236 : i32 to index
    %c0_230 = arith.constant 0 : index
    %238 = vector.load %arg11[%237, %c0_230] : memref<64x128xf32, #tpu.memory_space<vmem>>, vector<8x128xf32>
    %c0_231 = arith.constant 0 : index
    %c0_232 = arith.constant 0 : index
    %239 = vector.load %arg5[%c0_231, %c0_232] : memref<32x128xf32, #tpu.memory_space<vmem>>, vector<32x128xf32>
    %cst_233 = arith.constant dense<0.000000e+00> : vector<8x128xf32>
    %240 = tpu.matmul %233, %239, %cst_233 {dimension_numbers = #tpu.dot_dimension_numbers<[1], [0], [0], [1], [0, 0, 1, 1], [], []>} : vector<8x32xf32>, vector<32x128xf32>, vector<8x128xf32> -> vector<8x128xf32>
    %241 = arith.addf %238, %240 : vector<8x128xf32>
    %242 = arith.negf %241 : vector<8x128xf32>
    %243 = math.exp %242 : vector<8x128xf32>
    %cst_234 = arith.constant 1.000000e+00 : f32
    %244 = vector.broadcast %cst_234 : f32 to vector<8x128xf32>
    %245 = arith.addf %244, %243 : vector<8x128xf32>
    %246 = arith.divf %244, %245 : vector<8x128xf32>
    %247 = math.tanh %241 : vector<8x128xf32>
    %248 = vector.extract_strided_slice %246 {offsets = [0, 0], sizes = [8, 32], strides = [1, 1]} : vector<8x128xf32> to vector<8x32xf32>
    %249 = vector.extract_strided_slice %246 {offsets = [0, 32], sizes = [8, 32], strides = [1, 1]} : vector<8x128xf32> to vector<8x32xf32>
    %250 = vector.extract_strided_slice %247 {offsets = [0, 64], sizes = [8, 32], strides = [1, 1]} : vector<8x128xf32> to vector<8x32xf32>
    %251 = vector.extract_strided_slice %246 {offsets = [0, 96], sizes = [8, 32], strides = [1, 1]} : vector<8x128xf32> to vector<8x32xf32>
    %252 = arith.mulf %249, %234 : vector<8x32xf32>
    %253 = arith.mulf %248, %250 : vector<8x32xf32>
    %254 = arith.addf %252, %253 : vector<8x32xf32>
    %255 = math.tanh %254 : vector<8x32xf32>
    %256 = arith.mulf %251, %255 : vector<8x32xf32>
    %257 = arith.index_cast %c0_i32 : i32 to index
    %c0_235 = arith.constant 0 : index
    %c0_236 = arith.constant 0 : index
    %258 = vector.load %arg12[%257, %c0_235, %c0_236] : memref<8x8x32xf32, #tpu.memory_space<vmem>>, vector<1x8x32xf32>
    %259 = vector.shape_cast %258 : vector<1x8x32xf32> to vector<8x32xf32>
    %260 = vector.shape_cast %256 : vector<8x32xf32> to vector<1x8x32xf32>
    tpu.vector_store %arg12[%257, %c0_235, %c0_236], %260 {strides = array<i32>} : memref<8x8x32xf32, #tpu.memory_space<vmem>>, vector<1x8x32xf32>,
    %c1_i32 = arith.constant 1 : i32
    %c8_i32_237 = arith.constant 8 : i32
    %261 = arith.muli %c1_i32, %c8_i32_237 : i32
    %262 = tpu.assume_multiple %261, 8 : i32
    %263 = arith.index_cast %262 : i32 to index
    %c0_238 = arith.constant 0 : index
    %264 = vector.load %arg11[%263, %c0_238] : memref<64x128xf32, #tpu.memory_space<vmem>>, vector<8x128xf32>
    %c0_239 = arith.constant 0 : index
    %c0_240 = arith.constant 0 : index
    %265 = vector.load %arg5[%c0_239, %c0_240] : memref<32x128xf32, #tpu.memory_space<vmem>>, vector<32x128xf32>
    %cst_241 = arith.constant dense<0.000000e+00> : vector<8x128xf32>
    %266 = tpu.matmul %256, %265, %cst_241 {dimension_numbers = #tpu.dot_dimension_numbers<[1], [0], [0], [1], [0, 0, 1, 1], [], []>} : vector<8x32xf32>, vector<32x128xf32>, vector<8x128xf32> -> vector<8x128xf32>
    %267 = arith.addf %264, %266 : vector<8x128xf32>
    %268 = arith.negf %267 : vector<8x128xf32>
    %269 = math.exp %268 : vector<8x128xf32>
    %cst_242 = arith.constant 1.000000e+00 : f32
    %270 = vector.broadcast %cst_242 : f32 to vector<8x128xf32>
    %271 = arith.addf %270, %269 : vector<8x128xf32>
    %272 = arith.divf %270, %271 : vector<8x128xf32>
    %273 = math.tanh %267 : vector<8x128xf32>
    %274 = vector.extract_strided_slice %272 {offsets = [0, 0], sizes = [8, 32], strides = [1, 1]} : vector<8x128xf32> to vector<8x32xf32>
    %275 = vector.extract_strided_slice %272 {offsets = [0, 32], sizes = [8, 32], strides = [1, 1]} : vector<8x128xf32> to vector<8x32xf32>
    %276 = vector.extract_strided_slice %273 {offsets = [0, 64], sizes = [8, 32], strides = [1, 1]} : vector<8x128xf32> to vector<8x32xf32>
    %277 = vector.extract_strided_slice %272 {offsets = [0, 96], sizes = [8, 32], strides = [1, 1]} : vector<8x128xf32> to vector<8x32xf32>
    %278 = arith.mulf %275, %254 : vector<8x32xf32>
    %279 = arith.mulf %274, %276 : vector<8x32xf32>
    %280 = arith.addf %278, %279 : vector<8x32xf32>
    %281 = math.tanh %280 : vector<8x32xf32>
    %282 = arith.mulf %277, %281 : vector<8x32xf32>
    %283 = arith.index_cast %c1_i32 : i32 to index
    %c0_243 = arith.constant 0 : index
    %c0_244 = arith.constant 0 : index
    %284 = vector.load %arg12[%283, %c0_243, %c0_244] : memref<8x8x32xf32, #tpu.memory_space<vmem>>, vector<1x8x32xf32>
    %285 = vector.shape_cast %284 : vector<1x8x32xf32> to vector<8x32xf32>
    %286 = vector.shape_cast %282 : vector<8x32xf32> to vector<1x8x32xf32>
    tpu.vector_store %arg12[%283, %c0_243, %c0_244], %286 {strides = array<i32>} : memref<8x8x32xf32, #tpu.memory_space<vmem>>, vector<1x8x32xf32>,
    %c2_i32 = arith.constant 2 : i32
    %c8_i32_245 = arith.constant 8 : i32
    %287 = arith.muli %c2_i32, %c8_i32_245 : i32
    %288 = tpu.assume_multiple %287, 8 : i32
    %289 = arith.index_cast %288 : i32 to index
    %c0_246 = arith.constant 0 : index
    %290 = vector.load %arg11[%289, %c0_246] : memref<64x128xf32, #tpu.memory_space<vmem>>, vector<8x128xf32>
    %c0_247 = arith.constant 0 : index
    %c0_248 = arith.constant 0 : index
    %291 = vector.load %arg5[%c0_247, %c0_248] : memref<32x128xf32, #tpu.memory_space<vmem>>, vector<32x128xf32>
    %cst_249 = arith.constant dense<0.000000e+00> : vector<8x128xf32>
    %292 = tpu.matmul %282, %291, %cst_249 {dimension_numbers = #tpu.dot_dimension_numbers<[1], [0], [0], [1], [0, 0, 1, 1], [], []>} : vector<8x32xf32>, vector<32x128xf32>, vector<8x128xf32> -> vector<8x128xf32>
    %293 = arith.addf %290, %292 : vector<8x128xf32>
    %294 = arith.negf %293 : vector<8x128xf32>
    %295 = math.exp %294 : vector<8x128xf32>
    %cst_250 = arith.constant 1.000000e+00 : f32
    %296 = vector.broadcast %cst_250 : f32 to vector<8x128xf32>
    %297 = arith.addf %296, %295 : vector<8x128xf32>
    %298 = arith.divf %296, %297 : vector<8x128xf32>
    %299 = math.tanh %293 : vector<8x128xf32>
    %300 = vector.extract_strided_slice %298 {offsets = [0, 0], sizes = [8, 32], strides = [1, 1]} : vector<8x128xf32> to vector<8x32xf32>
    %301 = vector.extract_strided_slice %298 {offsets = [0, 32], sizes = [8, 32], strides = [1, 1]} : vector<8x128xf32> to vector<8x32xf32>
    %302 = vector.extract_strided_slice %299 {offsets = [0, 64], sizes = [8, 32], strides = [1, 1]} : vector<8x128xf32> to vector<8x32xf32>
    %303 = vector.extract_strided_slice %298 {offsets = [0, 96], sizes = [8, 32], strides = [1, 1]} : vector<8x128xf32> to vector<8x32xf32>
    %304 = arith.mulf %301, %280 : vector<8x32xf32>
    %305 = arith.mulf %300, %302 : vector<8x32xf32>
    %306 = arith.addf %304, %305 : vector<8x32xf32>
    %307 = math.tanh %306 : vector<8x32xf32>
    %308 = arith.mulf %303, %307 : vector<8x32xf32>
    %309 = arith.index_cast %c2_i32 : i32 to index
    %c0_251 = arith.constant 0 : index
    %c0_252 = arith.constant 0 : index
    %310 = vector.load %arg12[%309, %c0_251, %c0_252] : memref<8x8x32xf32, #tpu.memory_space<vmem>>, vector<1x8x32xf32>
    %311 = vector.shape_cast %310 : vector<1x8x32xf32> to vector<8x32xf32>
    %312 = vector.shape_cast %308 : vector<8x32xf32> to vector<1x8x32xf32>
    tpu.vector_store %arg12[%309, %c0_251, %c0_252], %312 {strides = array<i32>} : memref<8x8x32xf32, #tpu.memory_space<vmem>>, vector<1x8x32xf32>,
    %c3_i32 = arith.constant 3 : i32
    %c8_i32_253 = arith.constant 8 : i32
    %313 = arith.muli %c3_i32, %c8_i32_253 : i32
    %314 = tpu.assume_multiple %313, 8 : i32
    %315 = arith.index_cast %314 : i32 to index
    %c0_254 = arith.constant 0 : index
    %316 = vector.load %arg11[%315, %c0_254] : memref<64x128xf32, #tpu.memory_space<vmem>>, vector<8x128xf32>
    %c0_255 = arith.constant 0 : index
    %c0_256 = arith.constant 0 : index
    %317 = vector.load %arg5[%c0_255, %c0_256] : memref<32x128xf32, #tpu.memory_space<vmem>>, vector<32x128xf32>
    %cst_257 = arith.constant dense<0.000000e+00> : vector<8x128xf32>
    %318 = tpu.matmul %308, %317, %cst_257 {dimension_numbers = #tpu.dot_dimension_numbers<[1], [0], [0], [1], [0, 0, 1, 1], [], []>} : vector<8x32xf32>, vector<32x128xf32>, vector<8x128xf32> -> vector<8x128xf32>
    %319 = arith.addf %316, %318 : vector<8x128xf32>
    %320 = arith.negf %319 : vector<8x128xf32>
    %321 = math.exp %320 : vector<8x128xf32>
    %cst_258 = arith.constant 1.000000e+00 : f32
    %322 = vector.broadcast %cst_258 : f32 to vector<8x128xf32>
    %323 = arith.addf %322, %321 : vector<8x128xf32>
    %324 = arith.divf %322, %323 : vector<8x128xf32>
    %325 = math.tanh %319 : vector<8x128xf32>
    %326 = vector.extract_strided_slice %324 {offsets = [0, 0], sizes = [8, 32], strides = [1, 1]} : vector<8x128xf32> to vector<8x32xf32>
    %327 = vector.extract_strided_slice %324 {offsets = [0, 32], sizes = [8, 32], strides = [1, 1]} : vector<8x128xf32> to vector<8x32xf32>
    %328 = vector.extract_strided_slice %325 {offsets = [0, 64], sizes = [8, 32], strides = [1, 1]} : vector<8x128xf32> to vector<8x32xf32>
    %329 = vector.extract_strided_slice %324 {offsets = [0, 96], sizes = [8, 32], strides = [1, 1]} : vector<8x128xf32> to vector<8x32xf32>
    %330 = arith.mulf %327, %306 : vector<8x32xf32>
    %331 = arith.mulf %326, %328 : vector<8x32xf32>
    %332 = arith.addf %330, %331 : vector<8x32xf32>
    %333 = math.tanh %332 : vector<8x32xf32>
    %334 = arith.mulf %329, %333 : vector<8x32xf32>
    %335 = arith.index_cast %c3_i32 : i32 to index
    %c0_259 = arith.constant 0 : index
    %c0_260 = arith.constant 0 : index
    %336 = vector.load %arg12[%335, %c0_259, %c0_260] : memref<8x8x32xf32, #tpu.memory_space<vmem>>, vector<1x8x32xf32>
    %337 = vector.shape_cast %336 : vector<1x8x32xf32> to vector<8x32xf32>
    %338 = vector.shape_cast %334 : vector<8x32xf32> to vector<1x8x32xf32>
    tpu.vector_store %arg12[%335, %c0_259, %c0_260], %338 {strides = array<i32>} : memref<8x8x32xf32, #tpu.memory_space<vmem>>, vector<1x8x32xf32>,
    %c4_i32 = arith.constant 4 : i32
    %c8_i32_261 = arith.constant 8 : i32
    %339 = arith.muli %c4_i32, %c8_i32_261 : i32
    %340 = tpu.assume_multiple %339, 8 : i32
    %341 = arith.index_cast %340 : i32 to index
    %c0_262 = arith.constant 0 : index
    %342 = vector.load %arg11[%341, %c0_262] : memref<64x128xf32, #tpu.memory_space<vmem>>, vector<8x128xf32>
    %c0_263 = arith.constant 0 : index
    %c0_264 = arith.constant 0 : index
    %343 = vector.load %arg5[%c0_263, %c0_264] : memref<32x128xf32, #tpu.memory_space<vmem>>, vector<32x128xf32>
    %cst_265 = arith.constant dense<0.000000e+00> : vector<8x128xf32>
    %344 = tpu.matmul %334, %343, %cst_265 {dimension_numbers = #tpu.dot_dimension_numbers<[1], [0], [0], [1], [0, 0, 1, 1], [], []>} : vector<8x32xf32>, vector<32x128xf32>, vector<8x128xf32> -> vector<8x128xf32>
    %345 = arith.addf %342, %344 : vector<8x128xf32>
    %346 = arith.negf %345 : vector<8x128xf32>
    %347 = math.exp %346 : vector<8x128xf32>
    %cst_266 = arith.constant 1.000000e+00 : f32
    %348 = vector.broadcast %cst_266 : f32 to vector<8x128xf32>
    %349 = arith.addf %348, %347 : vector<8x128xf32>
    %350 = arith.divf %348, %349 : vector<8x128xf32>
    %351 = math.tanh %345 : vector<8x128xf32>
    %352 = vector.extract_strided_slice %350 {offsets = [0, 0], sizes = [8, 32], strides = [1, 1]} : vector<8x128xf32> to vector<8x32xf32>
    %353 = vector.extract_strided_slice %350 {offsets = [0, 32], sizes = [8, 32], strides = [1, 1]} : vector<8x128xf32> to vector<8x32xf32>
    %354 = vector.extract_strided_slice %351 {offsets = [0, 64], sizes = [8, 32], strides = [1, 1]} : vector<8x128xf32> to vector<8x32xf32>
    %355 = vector.extract_strided_slice %350 {offsets = [0, 96], sizes = [8, 32], strides = [1, 1]} : vector<8x128xf32> to vector<8x32xf32>
    %356 = arith.mulf %353, %332 : vector<8x32xf32>
    %357 = arith.mulf %352, %354 : vector<8x32xf32>
    %358 = arith.addf %356, %357 : vector<8x32xf32>
    %359 = math.tanh %358 : vector<8x32xf32>
    %360 = arith.mulf %355, %359 : vector<8x32xf32>
    %361 = arith.index_cast %c4_i32 : i32 to index
    %c0_267 = arith.constant 0 : index
    %c0_268 = arith.constant 0 : index
    %362 = vector.load %arg12[%361, %c0_267, %c0_268] : memref<8x8x32xf32, #tpu.memory_space<vmem>>, vector<1x8x32xf32>
    %363 = vector.shape_cast %362 : vector<1x8x32xf32> to vector<8x32xf32>
    %364 = vector.shape_cast %360 : vector<8x32xf32> to vector<1x8x32xf32>
    tpu.vector_store %arg12[%361, %c0_267, %c0_268], %364 {strides = array<i32>} : memref<8x8x32xf32, #tpu.memory_space<vmem>>, vector<1x8x32xf32>,
    %c5_i32 = arith.constant 5 : i32
    %c8_i32_269 = arith.constant 8 : i32
    %365 = arith.muli %c5_i32, %c8_i32_269 : i32
    %366 = tpu.assume_multiple %365, 8 : i32
    %367 = arith.index_cast %366 : i32 to index
    %c0_270 = arith.constant 0 : index
    %368 = vector.load %arg11[%367, %c0_270] : memref<64x128xf32, #tpu.memory_space<vmem>>, vector<8x128xf32>
    %c0_271 = arith.constant 0 : index
    %c0_272 = arith.constant 0 : index
    %369 = vector.load %arg5[%c0_271, %c0_272] : memref<32x128xf32, #tpu.memory_space<vmem>>, vector<32x128xf32>
    %cst_273 = arith.constant dense<0.000000e+00> : vector<8x128xf32>
    %370 = tpu.matmul %360, %369, %cst_273 {dimension_numbers = #tpu.dot_dimension_numbers<[1], [0], [0], [1], [0, 0, 1, 1], [], []>} : vector<8x32xf32>, vector<32x128xf32>, vector<8x128xf32> -> vector<8x128xf32>
    %371 = arith.addf %368, %370 : vector<8x128xf32>
    %372 = arith.negf %371 : vector<8x128xf32>
    %373 = math.exp %372 : vector<8x128xf32>
    %cst_274 = arith.constant 1.000000e+00 : f32
    %374 = vector.broadcast %cst_274 : f32 to vector<8x128xf32>
    %375 = arith.addf %374, %373 : vector<8x128xf32>
    %376 = arith.divf %374, %375 : vector<8x128xf32>
    %377 = math.tanh %371 : vector<8x128xf32>
    %378 = vector.extract_strided_slice %376 {offsets = [0, 0], sizes = [8, 32], strides = [1, 1]} : vector<8x128xf32> to vector<8x32xf32>
    %379 = vector.extract_strided_slice %376 {offsets = [0, 32], sizes = [8, 32], strides = [1, 1]} : vector<8x128xf32> to vector<8x32xf32>
    %380 = vector.extract_strided_slice %377 {offsets = [0, 64], sizes = [8, 32], strides = [1, 1]} : vector<8x128xf32> to vector<8x32xf32>
    %381 = vector.extract_strided_slice %376 {offsets = [0, 96], sizes = [8, 32], strides = [1, 1]} : vector<8x128xf32> to vector<8x32xf32>
    %382 = arith.mulf %379, %358 : vector<8x32xf32>
    %383 = arith.mulf %378, %380 : vector<8x32xf32>
    %384 = arith.addf %382, %383 : vector<8x32xf32>
    %385 = math.tanh %384 : vector<8x32xf32>
    %386 = arith.mulf %381, %385 : vector<8x32xf32>
    %387 = arith.index_cast %c5_i32 : i32 to index
    %c0_275 = arith.constant 0 : index
    %c0_276 = arith.constant 0 : index
    %388 = vector.load %arg12[%387, %c0_275, %c0_276] : memref<8x8x32xf32, #tpu.memory_space<vmem>>, vector<1x8x32xf32>
    %389 = vector.shape_cast %388 : vector<1x8x32xf32> to vector<8x32xf32>
    %390 = vector.shape_cast %386 : vector<8x32xf32> to vector<1x8x32xf32>
    tpu.vector_store %arg12[%387, %c0_275, %c0_276], %390 {strides = array<i32>} : memref<8x8x32xf32, #tpu.memory_space<vmem>>, vector<1x8x32xf32>,
    %c6_i32 = arith.constant 6 : i32
    %c8_i32_277 = arith.constant 8 : i32
    %391 = arith.muli %c6_i32, %c8_i32_277 : i32
    %392 = tpu.assume_multiple %391, 8 : i32
    %393 = arith.index_cast %392 : i32 to index
    %c0_278 = arith.constant 0 : index
    %394 = vector.load %arg11[%393, %c0_278] : memref<64x128xf32, #tpu.memory_space<vmem>>, vector<8x128xf32>
    %c0_279 = arith.constant 0 : index
    %c0_280 = arith.constant 0 : index
    %395 = vector.load %arg5[%c0_279, %c0_280] : memref<32x128xf32, #tpu.memory_space<vmem>>, vector<32x128xf32>
    %cst_281 = arith.constant dense<0.000000e+00> : vector<8x128xf32>
    %396 = tpu.matmul %386, %395, %cst_281 {dimension_numbers = #tpu.dot_dimension_numbers<[1], [0], [0], [1], [0, 0, 1, 1], [], []>} : vector<8x32xf32>, vector<32x128xf32>, vector<8x128xf32> -> vector<8x128xf32>
    %397 = arith.addf %394, %396 : vector<8x128xf32>
    %398 = arith.negf %397 : vector<8x128xf32>
    %399 = math.exp %398 : vector<8x128xf32>
    %cst_282 = arith.constant 1.000000e+00 : f32
    %400 = vector.broadcast %cst_282 : f32 to vector<8x128xf32>
    %401 = arith.addf %400, %399 : vector<8x128xf32>
    %402 = arith.divf %400, %401 : vector<8x128xf32>
    %403 = math.tanh %397 : vector<8x128xf32>
    %404 = vector.extract_strided_slice %402 {offsets = [0, 0], sizes = [8, 32], strides = [1, 1]} : vector<8x128xf32> to vector<8x32xf32>
    %405 = vector.extract_strided_slice %402 {offsets = [0, 32], sizes = [8, 32], strides = [1, 1]} : vector<8x128xf32> to vector<8x32xf32>
    %406 = vector.extract_strided_slice %403 {offsets = [0, 64], sizes = [8, 32], strides = [1, 1]} : vector<8x128xf32> to vector<8x32xf32>
    %407 = vector.extract_strided_slice %402 {offsets = [0, 96], sizes = [8, 32], strides = [1, 1]} : vector<8x128xf32> to vector<8x32xf32>
    %408 = arith.mulf %405, %384 : vector<8x32xf32>
    %409 = arith.mulf %404, %406 : vector<8x32xf32>
    %410 = arith.addf %408, %409 : vector<8x32xf32>
    %411 = math.tanh %410 : vector<8x32xf32>
    %412 = arith.mulf %407, %411 : vector<8x32xf32>
    %413 = arith.index_cast %c6_i32 : i32 to index
    %c0_283 = arith.constant 0 : index
    %c0_284 = arith.constant 0 : index
    %414 = vector.load %arg12[%413, %c0_283, %c0_284] : memref<8x8x32xf32, #tpu.memory_space<vmem>>, vector<1x8x32xf32>
    %415 = vector.shape_cast %414 : vector<1x8x32xf32> to vector<8x32xf32>
    %416 = vector.shape_cast %412 : vector<8x32xf32> to vector<1x8x32xf32>
    tpu.vector_store %arg12[%413, %c0_283, %c0_284], %416 {strides = array<i32>} : memref<8x8x32xf32, #tpu.memory_space<vmem>>, vector<1x8x32xf32>,
    %c7_i32 = arith.constant 7 : i32
    %c8_i32_285 = arith.constant 8 : i32
    %417 = arith.muli %c7_i32, %c8_i32_285 : i32
    %418 = tpu.assume_multiple %417, 8 : i32
    %419 = arith.index_cast %418 : i32 to index
    %c0_286 = arith.constant 0 : index
    %420 = vector.load %arg11[%419, %c0_286] : memref<64x128xf32, #tpu.memory_space<vmem>>, vector<8x128xf32>
    %c0_287 = arith.constant 0 : index
    %c0_288 = arith.constant 0 : index
    %421 = vector.load %arg5[%c0_287, %c0_288] : memref<32x128xf32, #tpu.memory_space<vmem>>, vector<32x128xf32>
    %cst_289 = arith.constant dense<0.000000e+00> : vector<8x128xf32>
    %422 = tpu.matmul %412, %421, %cst_289 {dimension_numbers = #tpu.dot_dimension_numbers<[1], [0], [0], [1], [0, 0, 1, 1], [], []>} : vector<8x32xf32>, vector<32x128xf32>, vector<8x128xf32> -> vector<8x128xf32>
    %423 = arith.addf %420, %422 : vector<8x128xf32>
    %424 = arith.negf %423 : vector<8x128xf32>
    %425 = math.exp %424 : vector<8x128xf32>
    %cst_290 = arith.constant 1.000000e+00 : f32
    %426 = vector.broadcast %cst_290 : f32 to vector<8x128xf32>
    %427 = arith.addf %426, %425 : vector<8x128xf32>
    %428 = arith.divf %426, %427 : vector<8x128xf32>
    %429 = math.tanh %423 : vector<8x128xf32>
    %430 = vector.extract_strided_slice %428 {offsets = [0, 0], sizes = [8, 32], strides = [1, 1]} : vector<8x128xf32> to vector<8x32xf32>
    %431 = vector.extract_strided_slice %428 {offsets = [0, 32], sizes = [8, 32], strides = [1, 1]} : vector<8x128xf32> to vector<8x32xf32>
    %432 = vector.extract_strided_slice %429 {offsets = [0, 64], sizes = [8, 32], strides = [1, 1]} : vector<8x128xf32> to vector<8x32xf32>
    %433 = vector.extract_strided_slice %428 {offsets = [0, 96], sizes = [8, 32], strides = [1, 1]} : vector<8x128xf32> to vector<8x32xf32>
    %434 = arith.mulf %431, %410 : vector<8x32xf32>
    %435 = arith.mulf %430, %432 : vector<8x32xf32>
    %436 = arith.addf %434, %435 : vector<8x32xf32>
    %437 = math.tanh %436 : vector<8x32xf32>
    %438 = arith.mulf %433, %437 : vector<8x32xf32>
    %439 = arith.index_cast %c7_i32 : i32 to index
    %c0_291 = arith.constant 0 : index
    %c0_292 = arith.constant 0 : index
    %440 = vector.load %arg12[%439, %c0_291, %c0_292] : memref<8x8x32xf32, #tpu.memory_space<vmem>>, vector<1x8x32xf32>
    %441 = vector.shape_cast %440 : vector<1x8x32xf32> to vector<8x32xf32>
    %442 = vector.shape_cast %438 : vector<8x32xf32> to vector<1x8x32xf32>
    tpu.vector_store %arg12[%439, %c0_291, %c0_292], %442 {strides = array<i32>} : memref<8x8x32xf32, #tpu.memory_space<vmem>>, vector<1x8x32xf32>,
    %c8_i32_293 = arith.constant 8 : i32
    %c0_294 = arith.constant 0 : index
    %c0_295 = arith.constant 0 : index
    %c0_296 = arith.constant 0 : index
    %443 = vector.load %arg12[%c0_294, %c0_295, %c0_296] : memref<8x8x32xf32, #tpu.memory_space<vmem>>, vector<8x8x32xf32>
    %444 = vector.shape_cast %443 : vector<8x8x32xf32> to vector<64x32xf32>
    %c0_297 = arith.constant 0 : index
    %c0_298 = arith.constant 0 : index
    %445 = vector.load %arg7[%c0_297, %c0_298] : memref<32x128xf32, #tpu.memory_space<vmem>>, vector<32x128xf32>
    %cst_299 = arith.constant dense<0.000000e+00> : vector<64x128xf32>
    %446 = tpu.matmul %444, %445, %cst_299 {dimension_numbers = #tpu.dot_dimension_numbers<[1], [0], [0], [1], [0, 0, 1, 1], [], []>} : vector<64x32xf32>, vector<32x128xf32>, vector<64x128xf32> -> vector<64x128xf32>
    %c0_300 = arith.constant 0 : index
    %c0_301 = arith.constant 0 : index
    %447 = vector.load %arg8[%c0_300, %c0_301] : memref<1x128xf32, #tpu.memory_space<vmem>>, vector<1x128xf32>
    %448 = vector.broadcast %447 : vector<1x128xf32> to vector<64x128xf32>
    %449 = arith.addf %446, %448 : vector<64x128xf32>
    %450 = vector.extract_strided_slice %449 {offsets = [0, 0], sizes = [8, 128], strides = [1, 1]} : vector<64x128xf32> to vector<8x128xf32>
    %451 = vector.shape_cast %450 : vector<8x128xf32> to vector<8x1x128xf32>
    %c0_302 = arith.constant 0 : index
    %c0_303 = arith.constant 0 : index
    %c0_304 = arith.constant 0 : index
    %452 = vector.load %arg9[%c0_302, %c0_303, %c0_304] : memref<8x8x128xf32, #tpu.memory_space<vmem>>, vector<8x1x128xf32>
    tpu.vector_store %arg9[%c0_302, %c0_303, %c0_304], %451 {strides = array<i32>} : memref<8x8x128xf32, #tpu.memory_space<vmem>>, vector<8x1x128xf32>,
    %453 = vector.extract_strided_slice %449 {offsets = [8, 0], sizes = [8, 128], strides = [1, 1]} : vector<64x128xf32> to vector<8x128xf32>
    %454 = vector.shape_cast %453 : vector<8x128xf32> to vector<8x1x128xf32>
    %c0_305 = arith.constant 0 : index
    %c1_306 = arith.constant 1 : index
    %c0_307 = arith.constant 0 : index
    %455 = vector.load %arg9[%c0_305, %c1_306, %c0_307] : memref<8x8x128xf32, #tpu.memory_space<vmem>>, vector<8x1x128xf32>
    tpu.vector_store %arg9[%c0_305, %c1_306, %c0_307], %454 {strides = array<i32>} : memref<8x8x128xf32, #tpu.memory_space<vmem>>, vector<8x1x128xf32>,
    %456 = vector.extract_strided_slice %449 {offsets = [16, 0], sizes = [8, 128], strides = [1, 1]} : vector<64x128xf32> to vector<8x128xf32>
    %457 = vector.shape_cast %456 : vector<8x128xf32> to vector<8x1x128xf32>
    %c0_308 = arith.constant 0 : index
    %c2_309 = arith.constant 2 : index
    %c0_310 = arith.constant 0 : index
    %458 = vector.load %arg9[%c0_308, %c2_309, %c0_310] : memref<8x8x128xf32, #tpu.memory_space<vmem>>, vector<8x1x128xf32>
    tpu.vector_store %arg9[%c0_308, %c2_309, %c0_310], %457 {strides = array<i32>} : memref<8x8x128xf32, #tpu.memory_space<vmem>>, vector<8x1x128xf32>,
    %459 = vector.extract_strided_slice %449 {offsets = [24, 0], sizes = [8, 128], strides = [1, 1]} : vector<64x128xf32> to vector<8x128xf32>
    %460 = vector.shape_cast %459 : vector<8x128xf32> to vector<8x1x128xf32>
    %c0_311 = arith.constant 0 : index
    %c3_312 = arith.constant 3 : index
    %c0_313 = arith.constant 0 : index
    %461 = vector.load %arg9[%c0_311, %c3_312, %c0_313] : memref<8x8x128xf32, #tpu.memory_space<vmem>>, vector<8x1x128xf32>
    tpu.vector_store %arg9[%c0_311, %c3_312, %c0_313], %460 {strides = array<i32>} : memref<8x8x128xf32, #tpu.memory_space<vmem>>, vector<8x1x128xf32>,
    %462 = vector.extract_strided_slice %449 {offsets = [32, 0], sizes = [8, 128], strides = [1, 1]} : vector<64x128xf32> to vector<8x128xf32>
    %463 = vector.shape_cast %462 : vector<8x128xf32> to vector<8x1x128xf32>
    %c0_314 = arith.constant 0 : index
    %c4_315 = arith.constant 4 : index
    %c0_316 = arith.constant 0 : index
    %464 = vector.load %arg9[%c0_314, %c4_315, %c0_316] : memref<8x8x128xf32, #tpu.memory_space<vmem>>, vector<8x1x128xf32>
    tpu.vector_store %arg9[%c0_314, %c4_315, %c0_316], %463 {strides = array<i32>} : memref<8x8x128xf32, #tpu.memory_space<vmem>>, vector<8x1x128xf32>,
    %465 = vector.extract_strided_slice %449 {offsets = [40, 0], sizes = [8, 128], strides = [1, 1]} : vector<64x128xf32> to vector<8x128xf32>
    %466 = vector.shape_cast %465 : vector<8x128xf32> to vector<8x1x128xf32>
    %c0_317 = arith.constant 0 : index
    %c5_318 = arith.constant 5 : index
    %c0_319 = arith.constant 0 : index
    %467 = vector.load %arg9[%c0_317, %c5_318, %c0_319] : memref<8x8x128xf32, #tpu.memory_space<vmem>>, vector<8x1x128xf32>
    tpu.vector_store %arg9[%c0_317, %c5_318, %c0_319], %466 {strides = array<i32>} : memref<8x8x128xf32, #tpu.memory_space<vmem>>, vector<8x1x128xf32>,
    %468 = vector.extract_strided_slice %449 {offsets = [48, 0], sizes = [8, 128], strides = [1, 1]} : vector<64x128xf32> to vector<8x128xf32>
    %469 = vector.shape_cast %468 : vector<8x128xf32> to vector<8x1x128xf32>
    %c0_320 = arith.constant 0 : index
    %c6_321 = arith.constant 6 : index
    %c0_322 = arith.constant 0 : index
    %470 = vector.load %arg9[%c0_320, %c6_321, %c0_322] : memref<8x8x128xf32, #tpu.memory_space<vmem>>, vector<8x1x128xf32>
    tpu.vector_store %arg9[%c0_320, %c6_321, %c0_322], %469 {strides = array<i32>} : memref<8x8x128xf32, #tpu.memory_space<vmem>>, vector<8x1x128xf32>,
    %471 = vector.extract_strided_slice %449 {offsets = [56, 0], sizes = [8, 128], strides = [1, 1]} : vector<64x128xf32> to vector<8x128xf32>
    %472 = vector.shape_cast %471 : vector<8x128xf32> to vector<8x1x128xf32>
    %c0_323 = arith.constant 0 : index
    %c7_324 = arith.constant 7 : index
    %c0_325 = arith.constant 0 : index
    %473 = vector.load %arg9[%c0_323, %c7_324, %c0_325] : memref<8x8x128xf32, #tpu.memory_space<vmem>>, vector<8x1x128xf32>
    tpu.vector_store %arg9[%c0_323, %c7_324, %c0_325], %472 {strides = array<i32>} : memref<8x8x128xf32, #tpu.memory_space<vmem>>, vector<8x1x128xf32>,
    return
  }
  func.func @transform_0(%arg0: i32, %arg1: memref<8x8xi32, #tpu.memory_space<smem>>) -> (i32, i32) {
    %c0_i32 = arith.constant 0 : i32
    %c0_i32_0 = arith.constant 0 : i32
    %c0_i32_1 = arith.constant 0 : i32
    return %c0_i32, %c0_i32_0 : i32, i32
  }
  func.func @transform_1(%arg0: i32, %arg1: memref<8x8xi32, #tpu.memory_space<smem>>) -> (i32, i32) {
    %c0_i32 = arith.constant 0 : i32
    %c0_i32_0 = arith.constant 0 : i32
    %c0_i32_1 = arith.constant 0 : i32
    return %c0_i32, %c0_i32_0 : i32, i32
  }
  func.func @transform_2(%arg0: i32, %arg1: memref<8x8xi32, #tpu.memory_space<smem>>) -> (i32, i32) {
    %c0_i32 = arith.constant 0 : i32
    %c0_i32_0 = arith.constant 0 : i32
    %c0_i32_1 = arith.constant 0 : i32
    return %c0_i32, %c0_i32_0 : i32, i32
  }
  func.func @transform_3(%arg0: i32, %arg1: memref<8x8xi32, #tpu.memory_space<smem>>) -> (i32, i32) {
    %c0_i32 = arith.constant 0 : i32
    %c0_i32_0 = arith.constant 0 : i32
    %c0_i32_1 = arith.constant 0 : i32
    return %c0_i32, %c0_i32_0 : i32, i32
  }
  func.func @transform_4(%arg0: i32, %arg1: memref<8x8xi32, #tpu.memory_space<smem>>) -> (i32, i32) {
    %c0_i32 = arith.constant 0 : i32
    %c0_i32_0 = arith.constant 0 : i32
    %c0_i32_1 = arith.constant 0 : i32
    return %c0_i32, %c0_i32_0 : i32, i32
  }
  func.func @transform_5(%arg0: i32, %arg1: memref<8x8xi32, #tpu.memory_space<smem>>) -> (i32, i32) {
    %c0_i32 = arith.constant 0 : i32
    %c0_i32_0 = arith.constant 0 : i32
    %c0_i32_1 = arith.constant 0 : i32
    return %c0_i32, %c0_i32_0 : i32, i32
  }
  func.func @transform_6(%arg0: i32, %arg1: memref<8x8xi32, #tpu.memory_space<smem>>) -> (i32, i32) {
    %c0_i32 = arith.constant 0 : i32
    %c0_i32_0 = arith.constant 0 : i32
    %c0_i32_1 = arith.constant 0 : i32
    return %c0_i32, %c0_i32_0 : i32, i32
  }
  func.func @transform_7(%arg0: i32, %arg1: memref<8x8xi32, #tpu.memory_space<smem>>) -> (i32, i32, i32) {
    %c0_i32 = arith.constant 0 : i32
    %c0_i32_0 = arith.constant 0 : i32
    %c0_i32_1 = arith.constant 0 : i32
    %c0_i32_2 = arith.constant 0 : i32
    return %c0_i32, %c0_i32_0, %c0_i32_1 : i32, i32, i32
  }
}

</mosaic_0001>

<bundles_post_ra>
// kernel: tpu_custom_call.1
= control target key start
LH: loop header
LB: loop body
LE: loop exit
PB: predicated region body
PF: predicated region fallthrough
CT: control target
= control target key end

     0   :  { %s1477_s30 = smov [#allocation6]   ;;  %s2026_s0 = inlined_call_operand.vmem [shape: s32[8,8], index: 0, kind: input, shape index: {}]   ;;  %s2027_s1 = inlined_call_operand.vmem [shape: f32[8,32], index: 1, kind: input, shape index: {}]   ;;  %s2028_s2 = inlined_call_operand.vmem [shape: f32[128,32], index: 2, kind: input, shape index: {}]   ;;  %s2029_s3 = inlined_call_operand.vmem [shape: f32[32,128], index: 3, kind: input, shape index: {}]   ;;  %s2030_s4 = inlined_call_operand.vmem [shape: f32[32,128], index: 4, kind: input, shape index: {}]   ;;  %s2031_s5 = inlined_call_operand.vmem [shape: f32[1,128], index: 5, kind: input, shape index: {}]   ;;  %s2032_s6 = inlined_call_operand.vmem [shape: f32[32,128], index: 6, kind: input, shape index: {}]   ;;  %s2033_s7 = inlined_call_operand.vmem [shape: f32[1,128], index: 7, kind: input, shape index: {}]   ;;  %s2034_s8 = inlined_call_operand.hbm [shape: f32[8,8,128], index: 8, kind: output, shape index: {}]  }
   0x1   :  { %s14_s29 = sshll.u32 %s2026_s0, 4  ;;  %s15_s29 = int_to_ptr.vmem [resolvable:$true] %s14_s29 }
   0x2   :  { %17 = dma.vmem_to_smem %s15_s29, 128, %s1477_s30, [#allocation5] }
   0x3   :  { %1473 = dma.done.wait [#allocation5], 128 }
   0x4   :  { %1474 = vsyncadd [#allocation5], 4294967168 }
   0x5   :  { %20 = sfence }
   0x6   :  { %v275_v0 = vld [vmem:[%s2029_s3 + $0x18] sm:$0xff]  ;;  %v274_v1 = vld [vmem:[%s2029_s3 + $0x10] sm:$0xff]  ;;  %s1538_s13 = sld [smem:[#allocation6 + $0x5]]  ;;  %v273_v3 = vld [vmem:[%s2029_s3 + $0x8] sm:$0xff]  ;;  %vm37_vm0 = vcmask 261120  }
   0x7   :  { %1353 = vmatpush.msra.mxu2 %v275_v0  ;;  %v1543_v2 = vld [vmem:[%s2030_s4 + $0x18] sm:$0xff]  ;;  %316 = vmatpush.msra.mxu0 %v275_v0  ;;  %s1548_s17 = sld [smem:[#allocation6 + $0x85]]  ;;  %v1557_v4 = vld [vmem:[%s2030_s4 + $0x10] sm:$0xff]  ;;  %v36_v5 = vld [vmem:[%s2027_s1] sm:$0xff] }
   0x8   :  { %516 = vmatpush.msra.mxu3 %v1543_v2  ;;  %588 = vmatpush.msra.mxu1 %v1543_v2  ;;  %s1552_s18 = sld [smem:[#allocation6 + $0x105]]  ;;  %v272_v6 = vld [vmem:[%s2029_s3] sm:$0xff]  ;;  %38 = vst.msk [vmem:[#allocation2] sm:$0xff] %vm37_vm0, %v36_v5 }
   0x9   :  { %1354 = vmatpush.msra.mxu2 %v274_v1  ;;  %317 = vmatpush.msra.mxu0 %v274_v1  ;;  %s1565_s25 = sld [smem:[#allocation6 + $0x185]] }
   0xa   :  { %517 = vmatpush.msra.mxu3 %v1557_v4  ;;  %589 = vmatpush.msra.mxu1 %v1557_v4 }
   0xb   :  { %21 = vsyncpa [#allocation8], 0  ;;  %1355 = vmatpush.msra.mxu2 %v273_v3  ;;  %s1570_s26 = sld [smem:[#allocation6 + $0x205]]  ;;  %v1575_v7 = vld [vmem:[%s2030_s4 + $0x8] sm:$0xff]  ;;  %318 = vmatpush.msra.mxu0 %v273_v3  ;;  %vm42_vm1 = vcmask 253952   ;;  %v1590_v8 = vld [vmem:[%s2030_s4] sm:$0xff] }
   0xc   :  { %s1577_s3 = sld [smem:[#allocation6 + $0x285]]  ;;  %518 = vmatpush.msra.mxu3 %v1575_v7  ;;  %590 = vmatpush.msra.mxu1 %v1575_v7  ;;  %s201_s30 = scalar_lea.vmem %s2028_s2, %s1538_s13  ;;  %v1478_v28 = vmov 0.0   ;;  %v1702_v32 = vld [vmem:[%s2031_s5] ss:$0 sm:$0xff] }
   0xd   :  { %1356 = vmatpush.msra.mxu2 %v272_v6  ;;  %s1585_s9 = sld [smem:[#allocation6 + $0x305]]  ;;  %319 = vmatpush.msra.mxu0 %v272_v6  ;;  %v202_v9 = vld [vmem:[%s201_s30] sm:$0x1]  ;;  %s205_s15 = scalar_lea.vmem %s2028_s2, %s1548_s17 }
   0xe   :  { %s1596_s0 = sld [smem:[#allocation6 + $0x385]]  ;;  %519 = vmatpush.msra.mxu3 %v1590_v8  ;;  %203 = vst.msk [vmem:[#allocation2 + $0x30] sm:$0x1] %vm42_vm1, %v202_v9  ;;  %v206_v10 = vld [vmem:[%s205_s15] sm:$0x1]  ;;  %s209_s19 = scalar_lea.vmem %s2028_s2, %s1552_s18  ;;  %591 = vmatpush.msra.mxu1 %v1590_v8 }
   0xf   :  { %373 = vmatpush.msrb.mxu2 %v1543_v2  ;;  %s1605_s20 = sld [smem:[#allocation6 + $0x6]]  ;;  %207 = vst.msk [vmem:[#allocation2 + $0x31] sm:$0x1] %vm42_vm1, %v206_v10  ;;  %v210_v11 = vld [vmem:[%s209_s19] sm:$0x1]  ;;  %s213_s22 = scalar_lea.vmem %s2028_s2, %s1565_s25 }
  0x10   :  { %732 = vmatpush.msrb.mxu3 %v1543_v2  ;;  %s1615_s23 = sld [smem:[#allocation6 + $0x86]]  ;;  %211 = vst.msk [vmem:[#allocation2 + $0x32] sm:$0x1] %vm42_vm1, %v210_v11  ;;  %v214_v12 = vld [vmem:[%s213_s22] sm:$0x1]  ;;  %s1480_s21 = smov 32  }
  0x11   :  { %374 = vmatpush.msrb.mxu2 %v1557_v4  ;;  %s217_s27 = scalar_lea.vmem %s2028_s2, %s1570_s26  ;;  %s1622_s1 = sld [smem:[#allocation6 + $0x106]]  ;;  %215 = vst.msk [vmem:[#allocation2 + $0x33] sm:$0x1] %vm42_vm1, %v214_v12  ;;  %v264_v19 = vld [vmem:[#allocation2] sm:$0xff] }
  0x12   :  { %733 = vmatpush.msrb.mxu3 %v1557_v4  ;;  %v218_v13 = vld [vmem:[%s217_s27] sm:$0x1]  ;;  %s221_s29 = scalar_lea.vmem %s2028_s2, %s1577_s3  ;;  %s1630_s30 = sld [smem:[#allocation6 + $0x186]]  ;;  %1322 = vmatmul.msk.f32.vlgmr.msra.gmra.mxu0 %vm37_vm0, %v264_v19 }
  0x13   :  { %375 = vmatpush.msrb.mxu2 %v1575_v7  ;;  %219 = vst.msk [vmem:[#allocation2 + $0x34] sm:$0x1] %vm42_vm1, %v218_v13  ;;  %v222_v14 = vld [vmem:[%s221_s29] sm:$0x1]  ;;  %s225_s11 = scalar_lea.vmem %s2028_s2, %s1585_s9  ;;  %s1318_s12 = sld [smem:[#allocation6 + $0x206]] }
  0x14   :  { %734 = vmatpush.msrb.mxu3 %v1575_v7  ;;  %223 = vst.msk [vmem:[#allocation2 + $0x35] sm:$0x1] %vm42_vm1, %v222_v14  ;;  %v226_v15 = vld [vmem:[%s225_s11] sm:$0x1]  ;;  %s229_s15 = scalar_lea.vmem %s2028_s2, %s1596_s0  ;;  %s1319_s13 = sld [smem:[#allocation6 + $0x286]] }
  0x15   :  { %376 = vmatpush.msrb.mxu2 %v1590_v8  ;;  %227 = vst.msk [vmem:[#allocation2 + $0x36] sm:$0x1] %vm42_vm1, %v226_v15  ;;  %v230_v16 = vld [vmem:[%s229_s15] sm:$0x1]  ;;  %s233_s19 = scalar_lea.vmem %s2028_s2, %s1605_s20  ;;  %s1320_s17 = sld [smem:[#allocation6 + $0x306]] }
  0x16   :  { %735 = vmatpush.msrb.mxu3 %v1590_v8  ;;  %231 = vst.msk [vmem:[#allocation2 + $0x37] sm:$0x1] %vm42_vm1, %v230_v16  ;;  %v234_v17 = vld [vmem:[%s233_s19] sm:$0x1]  ;;  %s237_s0 = scalar_lea.vmem %s2028_s2, %s1615_s23  ;;  %s1321_s18 = sld [smem:[#allocation6 + $0x386]] }
  0x17   :  { %235 = vst.msk [vmem:[#allocation2 + $0x38] sm:$0x1] %vm42_vm1, %v234_v17  ;;  %v238_v18 = vld [vmem:[%s237_s0] sm:$0x1]  ;;  %s241_s25 = scalar_lea.vmem %s2028_s2, %s1622_s1  ;;  %s39_s22 = sld [smem:[#allocation6]] }
  0x18   :  { %239 = vst.msk [vmem:[#allocation2 + $0x39] sm:$0x1] %vm42_vm1, %v238_v18  ;;  %v242_v20 = vld [vmem:[%s241_s25] sm:$0x1]  ;;  %s245_s29 = scalar_lea.vmem %s2028_s2, %s1630_s30  ;;  %s1267_s0 = sld [smem:[#allocation6 + $0x80]] }
  0x19   :  { %243 = vst.msk [vmem:[#allocation2 + $0x3a] sm:$0x1] %vm42_vm1, %v242_v20  ;;  %v246_v21 = vld [vmem:[%s245_s29] sm:$0x1]  ;;  %s249_s10 = scalar_lea.vmem %s2028_s2, %s1318_s12  ;;  %s1269_s24 = sld [smem:[#allocation6 + $0x180]] }
  0x1a   :  { %247 = vst.msk [vmem:[#allocation2 + $0x3b] sm:$0x1] %vm42_vm1, %v246_v21  ;;  %v250_v22 = vld [vmem:[%s249_s10] sm:$0x1]  ;;  %s253_s3 = scalar_lea.vmem %s2028_s2, %s1319_s13  ;;  %s1270_s27 = sld [smem:[#allocation6 + $0x200]] }
  0x1b   :  { %251 = vst.msk [vmem:[#allocation2 + $0x3c] sm:$0x1] %vm42_vm1, %v250_v22  ;;  %v254_v23 = vld [vmem:[%s253_s3] sm:$0x1]  ;;  %s257_s15 = scalar_lea.vmem %s2028_s2, %s1320_s17  ;;  %s1479_s17 = smov 64  }
  0x1c   :  { %255 = vst.msk [vmem:[#allocation2 + $0x3d] sm:$0x1] %vm42_vm1, %v254_v23  ;;  %v258_v24 = vld [vmem:[%s257_s15] sm:$0x1]  ;;  %s261_s12 = scalar_lea.vmem %s2028_s2, %s1321_s18  ;;  %s1268_s18 = sld [smem:[#allocation6 + $0x100]] }
  0x1d   :  { %v270_v25 = vld [vmem:[#allocation2 + $0x30] sm:$0xff]  ;;  %259 = vst.msk [vmem:[#allocation2 + $0x3e] sm:$0x1] %vm42_vm1, %v258_v24  ;;  %v262_v26 = vld [vmem:[%s261_s12] sm:$0x1]  ;;  %s1271_s25 = sld [smem:[#allocation6 + $0x280]]  ;;  %s40_s26 = scalar_lea.vmem %s2028_s2, %s39_s22 }
  0x1e   :  { %1328 = vmatmul.msk.f32.vlgmr.msra.gmra.mxu2 %vm37_vm0, %v270_v25  ;;  %263 = vst.msk [vmem:[#allocation2 + $0x3f] sm:$0x1] %vm42_vm1, %v262_v26  ;;  %s1272_s20 = sld [smem:[#allocation6 + $0x300]]  ;;  %s45_s11 = scalar_lea.vmem %s2028_s2, %s1267_s0  ;;  %v41_v58 = vld [vmem:[%s40_s26] sm:$0x1] }
  0x1f   :  { %444 = vmatpush.msra.mxu2 %v1543_v2  ;;  %s1273_s28 = sld [smem:[#allocation6 + $0x380]]  ;;  %s53_s9 = scalar_lea.vmem %s2028_s2, %s1269_s24  ;;  %v46_v59 = vld [vmem:[%s45_s11] sm:$0x1]  ;;  %43 = vst.msk [vmem:[#allocation2 + $0x8] sm:$0x1] %vm42_vm1, %v41_v58 }
  0x20   :  { %s57_s19 = scalar_lea.vmem %s2028_s2, %s1270_s27  ;;  %v54_v61 = vld [vmem:[%s53_s9] sm:$0x1]  ;;  %47 = vst.msk [vmem:[#allocation2 + $0x9] sm:$0x1] %vm42_vm1, %v46_v59  ;;  %s1277_s26 = sld [smem:[#allocation6 + $0x181]] }
  0x21   :  { %445 = vmatpush.msra.mxu2 %v1557_v4  ;;  %v58_v62 = vld [vmem:[%s57_s19] sm:$0x1]  ;;  %55 = vst.msk [vmem:[#allocation2 + $0xb] sm:$0x1] %vm42_vm1, %v54_v61  ;;  %s1278_s11 = sld [smem:[#allocation6 + $0x201]]  ;;  %s1199_s1 = sshll.u32 %s2034_s8, 4  ;;  %s1200_s1 = int_to_ptr.hbm [resolvable:$true] %s1199_s1 }
  0x22   :  { %s49_s14 = scalar_lea.vmem %s2028_s2, %s1268_s18  ;;  %59 = vst.msk [vmem:[#allocation2 + $0xc] sm:$0x1] %vm42_vm1, %v58_v62  ;;  %s1279_s3 = sld [smem:[#allocation6 + $0x281]] }
  0x23   :  { %446 = vmatpush.msra.mxu2 %v1575_v7  ;;  %v50_v60 = vld [vmem:[%s49_s14] sm:$0x1]  ;;  %s61_s23 = scalar_lea.vmem %s2028_s2, %s1271_s25  ;;  %s1274_s25 = sld [smem:[#allocation6 + $0x1]] }
  0x24   :  { %s65_s10 = scalar_lea.vmem %s2028_s2, %s1272_s20  ;;  %51 = vst.msk [vmem:[#allocation2 + $0xa] sm:$0x1] %vm42_vm1, %v50_v60  ;;  %v62_v63 = vld [vmem:[%s61_s23] sm:$0x1]  ;;  %s1275_s20 = sld [smem:[#allocation6 + $0x81]] }
  0x25   :  { %v271_v27 = vld [vmem:[#allocation2 + $0x38] sm:$0xff]  ;;  %447 = vmatpush.msra.mxu2 %v1590_v8  ;;  %s69_s27 = scalar_lea.vmem %s2028_s2, %s1273_s28  ;;  %v66_v0 = vld [vmem:[%s65_s10] sm:$0x1]  ;;  %63 = vst.msk [vmem:[#allocation2 + $0xd] sm:$0x1] %vm42_vm1, %v62_v63  ;;  %s1276_s28 = sld [smem:[#allocation6 + $0x101]] }
  0x26   :  { %1329 = vmatmul.msk.f32.gmra.mxu2 %vm37_vm0, %v271_v27  ;;  %v70_v1 = vld [vmem:[%s69_s27] sm:$0x1]  ;;  %67 = vst.msk [vmem:[#allocation2 + $0xe] sm:$0x1] %vm42_vm1, %v66_v0  ;;  %s1280_s30 = sld [smem:[#allocation6 + $0x301]]  ;;  %s85_s10 = scalar_lea.vmem %s2028_s2, %s1277_s26 }
  0x27   :  { %71 = vst.msk [vmem:[#allocation2 + $0xf] sm:$0x1] %vm42_vm1, %v70_v1  ;;  %s1281_s14 = sld [smem:[#allocation6 + $0x381]]  ;;  %s89_s27 = scalar_lea.vmem %s2028_s2, %s1278_s11 }
  0x28   :  { %s93_s16 = scalar_lea.vmem %s2028_s2, %s1279_s3  ;;  %s1282_s3 = sld [smem:[#allocation6 + $0x2]] }
  0x29   :  { %s73_s9 = scalar_lea.vmem %s2028_s2, %s1274_s25  ;;  %s1287_s22 = sld [smem:[#allocation6 + $0x282]] }
  0x2a   :  { %s77_s19 = scalar_lea.vmem %s2028_s2, %s1275_s20  ;;  %s1288_s29 = sld [smem:[#allocation6 + $0x302]] }
  0x2b   :  { %s81_s23 = scalar_lea.vmem %s2028_s2, %s1276_s28  ;;  %s1295_s25 = sld [smem:[#allocation6 + $0x283]] }
  0x2c   :  { %s97_s12 = scalar_lea.vmem %s2028_s2, %s1280_s30  ;;  %s1283_s30 = sld [smem:[#allocation6 + $0x82]] }
  0x2d   :  { %s101_s11 = scalar_lea.vmem %s2028_s2, %s1281_s14  ;;  %s1284_s14 = sld [smem:[#allocation6 + $0x102]] }
  0x2e   :  { %377 = vmatmul.f32.vlgmr.msrb.gmra.mxu2 %v1478_v28  ;;  %s1296_s15 = sld [smem:[#allocation6 + $0x303]] }
  0x2f   :  { %660 = vmatpush.msrb.mxu2 %v1543_v2  ;;  %v265_v2 = vld [vmem:[#allocation2 + $0x8] sm:$0xff]  ;;  %s125_s18 = scalar_lea.vmem %s2028_s2, %s1287_s22  ;;  %s1290_s22 = sld [smem:[#allocation6 + $0x3]] }
  0x30   :  { %1323 = vmatmul.msk.f32.gmra.mxu0 %vm37_vm0, %v265_v2  ;;  %s129_s24 = scalar_lea.vmem %s2028_s2, %s1288_s29  ;;  %s1291_s29 = sld [smem:[#allocation6 + $0x83]] }
  0x31   :  { %661 = vmatpush.msrb.mxu2 %v1557_v4  ;;  %s157_s28 = scalar_lea.vmem %s2028_s2, %s1295_s25  ;;  %s1298_s25 = sld [smem:[#allocation6 + $0x4]] }
  0x32   :  { %s1304_s0 = sld [smem:[#allocation6 + $0x304]] }
  0x33   :  { %662 = vmatpush.msrb.mxu2 %v1575_v7 }
  0x34   :  { %s161_s26 = scalar_lea.vmem %s2028_s2, %s1296_s15  ;;  %s1299_s15 = sld [smem:[#allocation6 + $0x84]] }
  0x35   :  { %663 = vmatpush.msrb.mxu2 %v1590_v8 }
  0x8f   :  { %v321_v31 = vpop.f32.mrf.mxu0 }
  0x90   :  { %v322_v33 = vadd.f32 %v1702_v32, %v321_v31 }
  0xa1   :  { %v1695_v29 = vpop.f32.mrf.mxu2 }
  0xa9   :  { %v1697_v30 = vpop.f32.mrf.mxu2 }
  0xad   :  { %v324_v4 = vpop.f32.mrf.mxu0 }
  0xae   :  { %v325_v5 = vadd.f32 %v1702_v32, %v324_v4 }
  0xb1   :  { %v378_v34 = vpop.f32.mrf.mxu2 }
  0xb2   :  { %v381_v35 = vadd.f32 %v378_v34, %v322_v33  ;;  %v74_v33 = vld [vmem:[%s73_s9] sm:$0x1]  ;;  %s1285_s9 = sld [smem:[#allocation6 + $0x182]] }
  0xb3   :  { %v78_v34 = vld [vmem:[%s77_s19] sm:$0x1]  ;;  %75 = vst.msk [vmem:[#allocation2 + $0x10] sm:$0x1] %vm42_vm1, %v74_v33  ;;  %s1286_s19 = sld [smem:[#allocation6 + $0x202]] }
  0xb4   :  { %1370 = vtanh.f32 %v381_v35  ;;  %v1330_v37 = vmul.f32 -1.442695, %v381_v35  ;;  %v82_v35 = vld [vmem:[%s81_s23] sm:$0x1]  ;;  %79 = vst.msk [vmem:[#allocation2 + $0x11] sm:$0x1] %vm42_vm1, %v78_v34 }
  0xb5   :  { %83 = vst.msk [vmem:[#allocation2 + $0x12] sm:$0x1] %vm42_vm1, %v82_v35  ;;  %s1289_s23 = sld [smem:[#allocation6 + $0x382]] }
  0xb6   :  { %1372 = vpow2.f32 %v1330_v37  ;;  %v90_v37 = vld [vmem:[%s89_s27] sm:$0x1]  ;;  %s109_s27 = scalar_lea.vmem %s2028_s2, %s1283_s30 }
  0xb7   :  { %91 = vst.msk [vmem:[#allocation2 + $0x14] sm:$0x1] %vm42_vm1, %v90_v37  ;;  %v110_v4 = vld [vmem:[%s109_s27] sm:$0x1]  ;;  %s1294_s27 = sld [smem:[#allocation6 + $0x203]] }
  0xb8   :  { %111 = vst.msk [vmem:[#allocation2 + $0x19] sm:$0x1] %vm42_vm1, %v110_v4 }
  0xba   :  { %v1371_v36 = vpop.eup %1370 }
  0xbb   :  { %404 = vrot.lane.b32.xlu0 %v1371_v36, %s1479_s17  ;;  %v86_v36 = vld [vmem:[%s85_s10] sm:$0x1]  ;;  %s105_s10 = scalar_lea.vmem %s2028_s2, %s1282_s3  ;;  %s1303_s3 = sld [smem:[#allocation6 + $0x284]] }
  0xbc   :  { %v1373_v38 = vpop.eup %1372  ;;  %87 = vst.msk [vmem:[#allocation2 + $0x13] sm:$0x1] %vm42_vm1, %v86_v36 }
  0xbd   :  { %v385_v39 = vadd.f32 1.0, %v1373_v38  ;;  %v94_v38 = vld [vmem:[%s93_s16] sm:$0x1]  ;;  %s113_s16 = scalar_lea.vmem %s2028_s2, %s1284_s14 }
  0xbe   :  { %95 = vst.msk [vmem:[#allocation2 + $0x15] sm:$0x1] %vm42_vm1, %v94_v38 }
  0xbf   :  { %1374 = vrcp.f32 %v385_v39  ;;  %v397_v45 = vand.u32 2147483648, %v385_v39  ;;  %vm391_vm3 = vweird.f32 %v385_v39  ;;  %v395_v46 = vand.u32 2147483647, %v385_v39 }
  0xc1   :  { %v398_v48 = vor.u32 1.1754944e-38, %v397_v45  ;;  %vm396_vm5 = vcmp.eq.f32.partialorder %v395_v46, 8.507059e+37  ;;  %s189_s14 = scalar_lea.vmem %s2028_s2, %s1303_s3  ;;  %s1483_s3 = smov 8  }
  0xc5   :  { %v1375_v40 = vpop.eup %1374 }
  0xc6   :  { %v387_v41 = vmul.f32 %v1375_v40, %v385_v39  ;;  %vm392_vm2 = vweird.f32 %v1375_v40  ;;  %v98_v39 = vld [vmem:[%s97_s12] sm:$0x1]  ;;  %s117_s12 = scalar_lea.vmem %s2028_s2, %s1285_s9  ;;  %s193_s9 = scalar_lea.vmem %s2028_s2, %s1304_s0 }
  0xc7   :  { %vm393_vm4 = vmor %vm391_vm3, %vm392_vm2  ;;  %99 = vst.msk [vmem:[#allocation2 + $0x16] sm:$0x1] %vm42_vm1, %v98_v39 }
  0xc8   :  { %v388_v42 = vsub.f32 1.0, %v387_v41 }
  0xca   :  { %v389_v43 = vmul.f32 %v1375_v40, %v388_v42 }
  0xcc   :  { %v390_v44 = vadd.f32 %v1375_v40, %v389_v43 }
  0xce   :  { %v394_v47 = vsel %vm393_vm4, %v1375_v40, %v390_v44  ;;  %v102_v40 = vld [vmem:[%s101_s11] sm:$0x1]  ;;  %s121_s11 = scalar_lea.vmem %s2028_s2, %s1286_s19  ;;  %s133_s19 = scalar_lea.vmem %s2028_s2, %s1289_s23 }
  0xcf   :  { %v399_v50 = vsel %vm396_vm5, %v398_v48, %v394_v47  ;;  %103 = vst.msk [vmem:[#allocation2 + $0x17] sm:$0x1] %vm42_vm1, %v102_v40  ;;  %s1292_s23 = sld [smem:[#allocation6 + $0x103]] }
  0xd0   :  { %v402_v52 = vmul.f32 0.0, %v399_v50 }
  0xd6   :  { %v266_v41 = vld [vmem:[#allocation2 + $0x10] sm:$0xff] }
  0xd7   :  { %1324 = vmatmul.msk.f32.gmra.mxu0 %vm37_vm0, %v266_v41 }
 0x12d   :  { %v405_v49 = vpop.permute.xlu0 %404 }
 0x12e   :  { %v407_v51 = vmul.f32 %v405_v49, %v399_v50 }
 0x130   :  { %409 = vrot.lane.b32.xlu0 %v407_v51, %s1480_s21 }
 0x154   :  { %v327_v43 = vpop.f32.mrf.mxu0 }
 0x155   :  { %v328_v44 = vadd.f32 %v1702_v32, %v327_v43 }
 0x1a2   :  { %v410_v53 = vpop.permute.xlu0 %409 }
 0x1a3   :  { %v1707_v54 = vadd.f32 %v410_v53, %v402_v52 }
 0x1a5   :  { %1376 = vtanh.f32 %v1707_v54 }
 0x1ab   :  { %v1377_v55 = vpop.eup %1376 }
 0x1ac   :  { %415 = vrot.lane.b32.xlu1 %v1377_v55, %s1479_s17 }
 0x21e   :  { %v416_v56 = vpop.permute.xlu1 %415 }
 0x21f   :  { %v418_v57 = vmul.f32 %v416_v56, %v399_v50 }
 0x221   :  { %420 = vrot.lane.b32.xlu1 %v418_v57, %s1480_s21 }
 0x293   :  { %v421_v3 = vpop.permute.xlu1 %420 }
 0x294   :  { %423 = vst.msk [vmem:[#allocation4] sm:$0xff] %vm37_vm0, %v421_v3  ;;  %1331 = vmatmul.msk.f32.vlgmr.msra.gmra.mxu2 %vm37_vm0, %v421_v3  ;;  %v106_v3 = vld [vmem:[%s105_s10] sm:$0x1]  ;;  %s1293_s10 = sld [smem:[#allocation6 + $0x183]] }
 0x295   :  { %107 = vst.msk [vmem:[#allocation2 + $0x18] sm:$0x1] %vm42_vm1, %v106_v3 }
 0x317   :  { %v449_v6 = vpop.f32.mrf.mxu2 }
 0x318   :  { %v452_v7 = vadd.f32 %v449_v6, %v325_v5  ;;  %v114_v5 = vld [vmem:[%s113_s16] sm:$0x1]  ;;  %s1297_s16 = sld [smem:[#allocation6 + $0x383]] }
 0x319   :  { %v118_v6 = vld [vmem:[%s117_s12] sm:$0x1]  ;;  %115 = vst.msk [vmem:[#allocation2 + $0x1a] sm:$0x1] %vm42_vm1, %v114_v5  ;;  %s137_s12 = scalar_lea.vmem %s2028_s2, %s1290_s22 }
 0x31a   :  { %1378 = vtanh.f32 %v452_v7  ;;  %v1332_v9 = vmul.f32 -1.442695, %v452_v7  ;;  %v122_v7 = vld [vmem:[%s121_s11] sm:$0x1]  ;;  %119 = vst.msk [vmem:[#allocation2 + $0x1b] sm:$0x1] %vm42_vm1, %v118_v6  ;;  %s141_s11 = scalar_lea.vmem %s2028_s2, %s1291_s29 }
 0x31b   :  { %123 = vst.msk [vmem:[#allocation2 + $0x1c] sm:$0x1] %vm42_vm1, %v122_v7 }
 0x31c   :  { %1380 = vpow2.f32 %v1332_v9  ;;  %v130_v9 = vld [vmem:[%s129_s24] sm:$0x1]  ;;  %s149_s24 = scalar_lea.vmem %s2028_s2, %s1293_s10 }
 0x31d   :  { %131 = vst.msk [vmem:[#allocation2 + $0x1e] sm:$0x1] %vm42_vm1, %v130_v9 }
 0x320   :  { %v1379_v8 = vpop.eup %1378 }
 0x321   :  { %475 = vrot.lane.b32.xlu2 %v1379_v8, %s1479_s17  ;;  %v126_v8 = vld [vmem:[%s125_s18] sm:$0x1]  ;;  %s145_s18 = scalar_lea.vmem %s2028_s2, %s1292_s23 }
 0x322   :  { %v1381_v10 = vpop.eup %1380  ;;  %127 = vst.msk [vmem:[#allocation2 + $0x1d] sm:$0x1] %vm42_vm1, %v126_v8 }
 0x323   :  { %v456_v11 = vadd.f32 1.0, %v1381_v10  ;;  %v134_v10 = vld [vmem:[%s133_s19] sm:$0x1]  ;;  %s153_s19 = scalar_lea.vmem %s2028_s2, %s1294_s27  ;;  %s165_s27 = scalar_lea.vmem %s2028_s2, %s1297_s16 }
 0x324   :  { %135 = vst.msk [vmem:[#allocation2 + $0x1f] sm:$0x1] %vm42_vm1, %v134_v10  ;;  %s1300_s16 = sld [smem:[#allocation6 + $0x104]] }
 0x325   :  { %1382 = vrcp.f32 %v456_v11  ;;  %v468_v17 = vand.u32 2147483648, %v456_v11  ;;  %vm462_vm7 = vweird.f32 %v456_v11  ;;  %v466_v18 = vand.u32 2147483647, %v456_v11 }
 0x327   :  { %v469_v20 = vor.u32 1.1754944e-38, %v468_v17  ;;  %vm467_vm9 = vcmp.eq.f32.partialorder %v466_v18, 8.507059e+37 }
 0x32b   :  { %v1383_v12 = vpop.eup %1382 }
 0x32c   :  { %v458_v13 = vmul.f32 %v1383_v12, %v456_v11  ;;  %vm463_vm6 = vweird.f32 %v1383_v12  ;;  %v267_v11 = vld [vmem:[#allocation2 + $0x18] sm:$0xff] }
 0x32d   :  { %vm464_vm8 = vmor %vm462_vm7, %vm463_vm6  ;;  %1325 = vmatmul.msk.f32.gmra.mxu0 %vm37_vm0, %v267_v11 }
 0x32e   :  { %v459_v14 = vsub.f32 1.0, %v458_v13 }
 0x330   :  { %v460_v15 = vmul.f32 %v1383_v12, %v459_v14 }
 0x332   :  { %v461_v16 = vadd.f32 %v1383_v12, %v460_v15 }
 0x334   :  { %v465_v19 = vsel %vm464_vm8, %v1383_v12, %v461_v16 }
 0x335   :  { %v470_v22 = vsel %vm467_vm9, %v469_v20, %v465_v19 }
 0x336   :  { %v473_v24 = vmul.f32 %v470_v22, %v1707_v54 }
 0x37b   :  { %v476_v21 = vpop.permute.xlu2 %475 }
 0x37c   :  { %v478_v23 = vmul.f32 %v476_v21, %v470_v22 }
 0x37e   :  { %480 = vrot.lane.b32.xlu2 %v478_v23, %s1480_s21 }
 0x3aa   :  { %v330_v15 = vpop.f32.mrf.mxu0 }
 0x3ab   :  { %v331_v16 = vadd.f32 %v1702_v32, %v330_v15 }
 0x3d8   :  { %v481_v25 = vpop.permute.xlu2 %480 }
 0x3d9   :  { %v1751_v26 = vadd.f32 %v481_v25, %v473_v24 }
 0x3db   :  { %1384 = vtanh.f32 %v1751_v26 }
 0x3e1   :  { %v1385_v27 = vpop.eup %1384 }
 0x3e2   :  { %486 = vrot.lane.b32.xlu0 %v1385_v27, %s1479_s17 }
 0x454   :  { %v487_v28 = vpop.permute.xlu0 %486 }
 0x455   :  { %v489_v31 = vmul.f32 %v487_v28, %v470_v22 }
 0x457   :  { %491 = vrot.lane.b32.xlu1 %v489_v31, %s1480_s21 }
 0x4c9   :  { %v492_v42 = vpop.permute.xlu1 %491 }
 0x4ca   :  { %495 = vst.msk [vmem:[#allocation4 + $0x8] sm:$0xff] %vm37_vm0, %v492_v42  ;;  %1333 = vmatmul.msk.f32.vlgmr.msra.gmra.mxu3 %vm37_vm0, %v492_v42 }
 0x54d   :  { %v521_v45 = vpop.f32.mrf.mxu3 }
 0x54e   :  { %v524_v46 = vadd.f32 %v521_v45, %v328_v44  ;;  %v138_v44 = vld [vmem:[%s137_s12] sm:$0x1]  ;;  %s1301_s12 = sld [smem:[#allocation6 + $0x184]] }
 0x54f   :  { %v142_v45 = vld [vmem:[%s141_s11] sm:$0x1]  ;;  %139 = vst.msk [vmem:[#allocation2 + $0x20] sm:$0x1] %vm42_vm1, %v138_v44  ;;  %s1302_s11 = sld [smem:[#allocation6 + $0x204]] }
 0x550   :  { %1386 = vtanh.f32 %v524_v46  ;;  %v1334_v48 = vmul.f32 -1.442695, %v524_v46  ;;  %v146_v46 = vld [vmem:[%s145_s18] sm:$0x1]  ;;  %143 = vst.msk [vmem:[#allocation2 + $0x21] sm:$0x1] %vm42_vm1, %v142_v45 }
 0x551   :  { %147 = vst.msk [vmem:[#allocation2 + $0x22] sm:$0x1] %vm42_vm1, %v146_v46  ;;  %s1305_s18 = sld [smem:[#allocation6 + $0x384]] }
 0x552   :  { %1388 = vpow2.f32 %v1334_v48  ;;  %v154_v48 = vld [vmem:[%s153_s19] sm:$0x1]  ;;  %s173_s19 = scalar_lea.vmem %s2028_s2, %s1299_s15 }
 0x553   :  { %155 = vst.msk [vmem:[#allocation2 + $0x24] sm:$0x1] %vm42_vm1, %v154_v48 }
 0x556   :  { %v1387_v47 = vpop.eup %1386 }
 0x557   :  { %547 = vrot.lane.b32.xlu2 %v1387_v47, %s1479_s17  ;;  %v150_v47 = vld [vmem:[%s149_s24] sm:$0x1]  ;;  %s169_s24 = scalar_lea.vmem %s2028_s2, %s1298_s25 }
 0x558   :  { %v1389_v49 = vpop.eup %1388  ;;  %151 = vst.msk [vmem:[#allocation2 + $0x23] sm:$0x1] %vm42_vm1, %v150_v47 }
 0x559   :  { %v528_v50 = vadd.f32 1.0, %v1389_v49  ;;  %v158_v49 = vld [vmem:[%s157_s28] sm:$0x1]  ;;  %s177_s28 = scalar_lea.vmem %s2028_s2, %s1300_s16 }
 0x55a   :  { %159 = vst.msk [vmem:[#allocation2 + $0x25] sm:$0x1] %vm42_vm1, %v158_v49 }
 0x55b   :  { %1390 = vrcp.f32 %v528_v50  ;;  %v540_v56 = vand.u32 2147483648, %v528_v50  ;;  %vm534_vm11 = vweird.f32 %v528_v50  ;;  %v538_v57 = vand.u32 2147483647, %v528_v50 }
 0x55d   :  { %v541_v59 = vor.u32 1.1754944e-38, %v540_v56  ;;  %vm539_vm13 = vcmp.eq.f32.partialorder %v538_v57, 8.507059e+37 }
 0x561   :  { %v1391_v51 = vpop.eup %1390 }
 0x562   :  { %v530_v52 = vmul.f32 %v1391_v51, %v528_v50  ;;  %vm535_vm10 = vweird.f32 %v1391_v51  ;;  %v162_v50 = vld [vmem:[%s161_s26] sm:$0x1]  ;;  %s181_s26 = scalar_lea.vmem %s2028_s2, %s1301_s12 }
 0x563   :  { %vm536_vm12 = vmor %vm534_vm11, %vm535_vm10  ;;  %163 = vst.msk [vmem:[#allocation2 + $0x26] sm:$0x1] %vm42_vm1, %v162_v50 }
 0x564   :  { %v531_v53 = vsub.f32 1.0, %v530_v52 }
 0x566   :  { %v532_v54 = vmul.f32 %v1391_v51, %v531_v53 }
 0x568   :  { %v533_v55 = vadd.f32 %v1391_v51, %v532_v54 }
 0x56a   :  { %v537_v58 = vsel %vm536_vm12, %v1391_v51, %v533_v55  ;;  %v166_v51 = vld [vmem:[%s165_s27] sm:$0x1]  ;;  %s185_s27 = scalar_lea.vmem %s2028_s2, %s1302_s11  ;;  %s197_s11 = scalar_lea.vmem %s2028_s2, %s1305_s18 }
 0x56b   :  { %v542_v61 = vsel %vm539_vm13, %v541_v59, %v537_v58  ;;  %167 = vst.msk [vmem:[#allocation2 + $0x27] sm:$0x1] %vm42_vm1, %v166_v51 }
 0x56c   :  { %v545_v63 = vmul.f32 %v542_v61, %v1751_v26 }
 0x572   :  { %v268_v52 = vld [vmem:[#allocation2 + $0x20] sm:$0xff] }
 0x573   :  { %1326 = vmatmul.msk.f32.gmra.mxu0 %vm37_vm0, %v268_v52 }
 0x5b1   :  { %v548_v60 = vpop.permute.xlu2 %547 }
 0x5b2   :  { %v550_v62 = vmul.f32 %v548_v60, %v542_v61 }
 0x5b4   :  { %552 = vrot.lane.b32.xlu0 %v550_v62, %s1480_s21 }
 0x5f0   :  { %v333_v54 = vpop.f32.mrf.mxu0 }
 0x5f1   :  { %v334_v55 = vadd.f32 %v1702_v32, %v333_v54 }
 0x626   :  { %v553_v0 = vpop.permute.xlu0 %552 }
 0x627   :  { %v1795_v1 = vadd.f32 %v553_v0, %v545_v63 }
 0x629   :  { %1392 = vtanh.f32 %v1795_v1 }
 0x62f   :  { %v1393_v2 = vpop.eup %1392 }
 0x630   :  { %558 = vrot.lane.b32.xlu1 %v1393_v2, %s1479_s17 }
 0x6a2   :  { %v559_v12 = vpop.permute.xlu1 %558 }
 0x6a3   :  { %v561_v13 = vmul.f32 %v559_v12, %v542_v61 }
 0x6a5   :  { %563 = vrot.lane.b32.xlu2 %v561_v13, %s1480_s21 }
 0x6ff   :  { %v564_v14 = vpop.permute.xlu2 %563 }
 0x700   :  { %567 = vst.msk [vmem:[#allocation4 + $0x10] sm:$0xff] %vm37_vm0, %v564_v14  ;;  %1335 = vmatmul.msk.f32.vlgmr.msra.gmra.mxu1 %vm37_vm0, %v564_v14 }
 0x77d   :  { %v593_v17 = vpop.f32.mrf.mxu1 }
 0x77e   :  { %v596_v18 = vadd.f32 %v593_v17, %v331_v16  ;;  %v170_v16 = vld [vmem:[%s169_s24] sm:$0x1] }
 0x77f   :  { %v174_v17 = vld [vmem:[%s173_s19] sm:$0x1]  ;;  %171 = vst.msk [vmem:[#allocation2 + $0x28] sm:$0x1] %vm42_vm1, %v170_v16  ;;  %v340_v16 = vadd.f32 %v1702_v32, %v1695_v29 }
 0x780   :  { %1394 = vtanh.f32 %v596_v18  ;;  %v1336_v20 = vmul.f32 -1.442695, %v596_v18  ;;  %v178_v18 = vld [vmem:[%s177_s28] sm:$0x1]  ;;  %175 = vst.msk [vmem:[#allocation2 + $0x29] sm:$0x1] %vm42_vm1, %v174_v17 }
 0x781   :  { %179 = vst.msk [vmem:[#allocation2 + $0x2a] sm:$0x1] %vm42_vm1, %v178_v18 }
 0x782   :  { %1396 = vpow2.f32 %v1336_v20  ;;  %v186_v20 = vld [vmem:[%s185_s27] sm:$0x1] }
 0x783   :  { %187 = vst.msk [vmem:[#allocation2 + $0x2c] sm:$0x1] %vm42_vm1, %v186_v20 }
 0x786   :  { %v1395_v19 = vpop.eup %1394 }
 0x787   :  { %619 = vrot.lane.b32.xlu0 %v1395_v19, %s1479_s17  ;;  %v182_v19 = vld [vmem:[%s181_s26] sm:$0x1] }
 0x788   :  { %v1397_v21 = vpop.eup %1396  ;;  %183 = vst.msk [vmem:[#allocation2 + $0x2b] sm:$0x1] %vm42_vm1, %v182_v19 }
 0x789   :  { %v600_v22 = vadd.f32 1.0, %v1397_v21  ;;  %v190_v21 = vld [vmem:[%s189_s14] sm:$0x1] }
 0x78a   :  { %191 = vst.msk [vmem:[#allocation2 + $0x2d] sm:$0x1] %vm42_vm1, %v190_v21 }
 0x78b   :  { %1398 = vrcp.f32 %v600_v22  ;;  %v612_v28 = vand.u32 2147483648, %v600_v22  ;;  %vm606_vm15 = vweird.f32 %v600_v22  ;;  %v610_v31 = vand.u32 2147483647, %v600_v22 }
 0x78d   :  { %v613_v34 = vor.u32 1.1754944e-38, %v612_v28  ;;  %vm611_vm3 = vcmp.eq.f32.partialorder %v610_v31, 8.507059e+37 }
 0x791   :  { %v1399_v23 = vpop.eup %1398 }
 0x792   :  { %v602_v24 = vmul.f32 %v1399_v23, %v600_v22  ;;  %vm607_vm14 = vweird.f32 %v1399_v23  ;;  %v194_v22 = vld [vmem:[%s193_s9] sm:$0x1] }
 0x793   :  { %vm608_vm2 = vmor %vm606_vm15, %vm607_vm14  ;;  %195 = vst.msk [vmem:[#allocation2 + $0x2e] sm:$0x1] %vm42_vm1, %v194_v22 }
 0x794   :  { %v603_v25 = vsub.f32 1.0, %v602_v24  ;;  %v1924_v24 = vld [vmem:[%s2032_s6 + $0x10] sm:$0xff] }
 0x796   :  { %v604_v26 = vmul.f32 %v1399_v23, %v603_v25  ;;  %v198_v25 = vld [vmem:[%s197_s11] sm:$0x1]  ;;  %s1482_s11 = smov 128  }
 0x797   :  { %199 = vst.msk [vmem:[#allocation2 + $0x2f] sm:$0x1] %vm42_vm1, %v198_v25 }
 0x798   :  { %v605_v27 = vadd.f32 %v1399_v23, %v604_v26  ;;  %v1933_v26 = vld [vmem:[%s2032_s6 + $0x8] sm:$0xff] }
 0x79a   :  { %v609_v33 = vsel %vm608_vm2, %v1399_v23, %v605_v27  ;;  %v1919_v23 = vld [vmem:[%s2032_s6 + $0x18] sm:$0xff]  ;;  %v1940_v27 = vld [vmem:[%s2032_s6] sm:$0xff] }
 0x79b   :  { %v614_v36 = vsel %vm611_vm3, %v613_v34, %v609_v33  ;;  %1357 = vmatpush.msra.mxu3 %v1919_v23 }
 0x79c   :  { %v617_v38 = vmul.f32 %v614_v36, %v1795_v1 }
 0x79d   :  { %1358 = vmatpush.msra.mxu3 %v1924_v24 }
 0x79e   :  { %v269_v28 = vld [vmem:[#allocation2 + $0x28] sm:$0xff] }
 0x79f   :  { %1359 = vmatpush.msra.mxu3 %v1933_v26  ;;  %1327 = vmatmul.msk.f32.gmra.mxu0 %vm37_vm0, %v269_v28 }
 0x7a1   :  { %1360 = vmatpush.msra.mxu3 %v1940_v27 }
 0x7f9   :  { %v620_v35 = vpop.permute.xlu0 %619 }
 0x7fa   :  { %v622_v37 = vmul.f32 %v620_v35, %v614_v36 }
 0x7fc   :  { %624 = vrot.lane.b32.xlu1 %v622_v37, %s1480_s21 }
 0x81c   :  { %v336_v34 = vpop.f32.mrf.mxu0 }
 0x81d   :  { %v337_v35 = vadd.f32 %v1702_v32, %v336_v34 }
 0x86e   :  { %v625_v39 = vpop.permute.xlu1 %624 }
 0x86f   :  { %v1839_v40 = vadd.f32 %v625_v39, %v617_v38  ;;  %v1952_v38 = vld [vmem:[%s2033_s7] ss:$0 sm:$0xff] }
 0x871   :  { %1400 = vtanh.f32 %v1839_v40 }
 0x877   :  { %v1401_v41 = vpop.eup %1400 }
 0x878   :  { %630 = vrot.lane.b32.xlu2 %v1401_v41, %s1479_s17 }
 0x8d2   :  { %v631_v42 = vpop.permute.xlu2 %630 }
 0x8d3   :  { %v633_v43 = vmul.f32 %v631_v42, %v614_v36 }
 0x8d5   :  { %635 = vrot.lane.b32.xlu0 %v633_v43, %s1480_s21 }
 0x947   :  { %v636_v53 = vpop.permute.xlu0 %635 }
 0x948   :  { %639 = vst.msk [vmem:[#allocation4 + $0x18] sm:$0xff] %vm37_vm0, %v636_v53  ;;  %1337 = vmatmul.msk.f32.vlgmr.msrb.gmra.mxu2 %vm37_vm0, %v636_v53 }
 0x9cb   :  { %v665_v56 = vpop.f32.mrf.mxu2 }
 0x9cc   :  { %v668_v57 = vadd.f32 %v665_v56, %v334_v55 }
 0x9ce   :  { %1402 = vtanh.f32 %v668_v57  ;;  %v1338_v59 = vmul.f32 -1.442695, %v668_v57 }
 0x9d0   :  { %1404 = vpow2.f32 %v1338_v59 }
 0x9d4   :  { %v1403_v58 = vpop.eup %1402 }
 0x9d5   :  { %691 = vrot.lane.b32.xlu1 %v1403_v58, %s1479_s17 }
 0x9d6   :  { %v1405_v60 = vpop.eup %1404 }
 0x9d7   :  { %v672_v61 = vadd.f32 1.0, %v1405_v60 }
 0x9d9   :  { %1406 = vrcp.f32 %v672_v61  ;;  %v684_v3 = vand.u32 2147483648, %v672_v61  ;;  %vm678_vm5 = vweird.f32 %v672_v61  ;;  %v682_v4 = vand.u32 2147483647, %v672_v61 }
 0x9db   :  { %v685_v6 = vor.u32 1.1754944e-38, %v684_v3  ;;  %vm683_vm7 = vcmp.eq.f32.partialorder %v682_v4, 8.507059e+37  ;;  %v789_v4 = vld [vmem:[%s2030_s4 + $0x18] sm:$0xff] }
 0x9dc   :  { %804 = vmatpush.msrb.mxu1 %v789_v4  ;;  %876 = vmatpush.msra.mxu2 %v789_v4 }
 0x9df   :  { %v1407_v62 = vpop.eup %1406 }
 0x9e0   :  { %v674_v63 = vmul.f32 %v1407_v62, %v672_v61  ;;  %vm679_vm4 = vweird.f32 %v1407_v62 }
 0x9e1   :  { %vm680_vm6 = vmor %vm678_vm5, %vm679_vm4 }
 0x9e2   :  { %v675_v0 = vsub.f32 1.0, %v674_v63 }
 0x9e4   :  { %v676_v1 = vmul.f32 %v1407_v62, %v675_v0 }
 0x9e6   :  { %v677_v2 = vadd.f32 %v1407_v62, %v676_v1 }
 0x9e8   :  { %v681_v5 = vsel %vm680_vm6, %v1407_v62, %v677_v2 }
 0x9e9   :  { %v686_v8 = vsel %vm683_vm7, %v685_v6, %v681_v5  ;;  %v788_v5 = vld [vmem:[%s2030_s4 + $0x10] sm:$0xff]  ;;  %v1434_v6 = vld [vmem:[%s2030_s4 + $0x8] sm:$0xff] }
 0x9ea   :  { %v689_v10 = vmul.f32 %v686_v8, %v1839_v40  ;;  %805 = vmatpush.msrb.mxu1 %v788_v5  ;;  %877 = vmatpush.msra.mxu2 %v788_v5 }
 0x9ec   :  { %806 = vmatpush.msrb.mxu1 %v1434_v6 }
 0xa47   :  { %v692_v7 = vpop.permute.xlu1 %691 }
 0xa48   :  { %v694_v9 = vmul.f32 %v692_v7, %v686_v8  ;;  %v1435_v7 = vld [vmem:[%s2030_s4] sm:$0xff] }
 0xa49   :  { %807 = vmatpush.msrb.mxu1 %v1435_v7 }
 0xa4a   :  { %696 = vrot.lane.b32.xlu2 %v694_v9, %s1480_s21 }
 0xa4b   :  { %980 = vmatpush.msra.mxu1 %v1919_v23 }
 0xa4d   :  { %981 = vmatpush.msra.mxu1 %v1924_v24 }
 0xa4f   :  { %982 = vmatpush.msra.mxu1 %v1933_v26 }
 0xa51   :  { %983 = vmatpush.msra.mxu1 %v1940_v27 }
 0xaa4   :  { %v697_v11 = vpop.permute.xlu2 %696 }
 0xaa5   :  { %v1883_v12 = vadd.f32 %v697_v11, %v689_v10  ;;  %v928_v11 = vld [vmem:[#allocation4] sm:$0xff] }
 0xaa7   :  { %1408 = vtanh.f32 %v1883_v12 }
 0xaad   :  { %v1409_v13 = vpop.eup %1408 }
 0xaae   :  { %702 = vrot.lane.b32.xlu0 %v1409_v13, %s1479_s17  ;;  %v929_v13 = vld [vmem:[#allocation4 + $0x8] sm:$0xff] }
 0xb20   :  { %v703_v14 = vpop.permute.xlu0 %702 }
 0xb21   :  { %v705_v15 = vmul.f32 %v703_v14, %v686_v8  ;;  %v930_v14 = vld [vmem:[#allocation4 + $0x10] sm:$0xff] }
 0xb23   :  { %707 = vrot.lane.b32.xlu1 %v705_v15, %s1480_s21  ;;  %v931_v15 = vld [vmem:[#allocation4 + $0x18] sm:$0xff] }
 0xb95   :  { %v708_v31 = vpop.permute.xlu1 %707 }
 0xb96   :  { %711 = vst.msk [vmem:[#allocation4 + $0x20] sm:$0xff] %vm37_vm0, %v708_v31  ;;  %1339 = vmatmul.msk.f32.vlgmr.msrb.gmra.mxu3 %vm37_vm0, %v708_v31 }
 0xb9d   :  { %v932_v33 = vld [vmem:[#allocation4 + $0x20] sm:$0xff] }
 0xb9e   :  { %1349 = vmatmul.msk.f32.vlgmr.msra.gmra.mxu3 %vm37_vm0, %v932_v33 }
 0xc19   :  { %v737_v36 = vpop.f32.mrf.mxu3 }
 0xc1a   :  { %v740_v37 = vadd.f32 %v737_v36, %v337_v35 }
 0xc1c   :  { %1410 = vtanh.f32 %v740_v37  ;;  %v1340_v49 = vmul.f32 -1.442695, %v740_v37 }
 0xc1e   :  { %1412 = vpow2.f32 %v1340_v49 }
 0xc21   :  { %v997_v39 = vpop.f32.mrf.mxu3 }
 0xc22   :  { %v1411_v40 = vpop.eup %1410  ;;  %v998_v41 = vadd.f32 %v1952_v38, %v997_v39 }
 0xc23   :  { %763 = vrot.lane.b32.xlu2 %v1411_v40, %s1479_s17 }
 0xc24   :  { %v1102_v42 = vrot.slane %v998_v41, 1  ;;  %v1103_v43 = vrot.slane %v998_v41, 2  ;;  %v1104_v44 = vrot.slane %v998_v41, 3  ;;  %1116 = vst [vmem:[#allocation7 + $0x4] sm:$0x1] %v998_v41  ;;  %v1105_v45 = vrot.slane %v998_v41, 4  ;;  %v1413_v50 = vpop.eup %1412 }
 0xc25   :  { %v1106_v46 = vrot.slane %v998_v41, 5  ;;  %v1107_v47 = vrot.slane %v998_v41, 6  ;;  %v1108_v48 = vrot.slane %v998_v41, 7  ;;  %v744_v51 = vadd.f32 1.0, %v1413_v50 }
 0xc26   :  { %1117 = vst [vmem:[#allocation7 + $0xc] sm:$0x1] %v1102_v42 }
 0xc27   :  { %1118 = vst [vmem:[#allocation7 + $0x14] sm:$0x1] %v1103_v43  ;;  %1414 = vrcp.f32 %v744_v51  ;;  %v756_v57 = vand.u32 2147483648, %v744_v51  ;;  %vm750_vm8 = vweird.f32 %v744_v51  ;;  %v754_v58 = vand.u32 2147483647, %v744_v51 }
 0xc28   :  { %1119 = vst [vmem:[#allocation7 + $0x1c] sm:$0x1] %v1104_v44 }
 0xc29   :  { %1120 = vst [vmem:[#allocation7 + $0x24] sm:$0x1] %v1105_v45  ;;  %v757_v60 = vor.u32 1.1754944e-38, %v756_v57  ;;  %vm755_vm10 = vcmp.eq.f32.partialorder %v754_v58, 8.507059e+37 }
 0xc2a   :  { %1121 = vst [vmem:[#allocation7 + $0x2c] sm:$0x1] %v1106_v46 }
 0xc2b   :  { %1122 = vst [vmem:[#allocation7 + $0x34] sm:$0x1] %v1107_v47 }
 0xc2c   :  { %1123 = vst [vmem:[#allocation7 + $0x3c] sm:$0x1] %v1108_v48 }
 0xc2d   :  { %v1415_v52 = vpop.eup %1414 }
 0xc2e   :  { %v746_v53 = vmul.f32 %v1415_v52, %v744_v51  ;;  %vm751_vm1 = vweird.f32 %v1415_v52 }
 0xc2f   :  { %vm752_vm9 = vmor %vm750_vm8, %vm751_vm1 }
 0xc30   :  { %v747_v54 = vsub.f32 1.0, %v746_v53 }
 0xc32   :  { %v748_v55 = vmul.f32 %v1415_v52, %v747_v54 }
 0xc34   :  { %v749_v56 = vadd.f32 %v1415_v52, %v748_v55 }
 0xc36   :  { %v753_v59 = vsel %vm752_vm9, %v1415_v52, %v749_v56 }
 0xc37   :  { %v758_v62 = vsel %vm755_vm10, %v757_v60, %v753_v59 }
 0xc38   :  { %v761_v0 = vmul.f32 %v758_v62, %v1883_v12 }
 0xc7d   :  { %v764_v61 = vpop.permute.xlu2 %763 }
 0xc7e   :  { %v766_v63 = vmul.f32 %v764_v61, %v758_v62 }
 0xc80   :  { %768 = vrot.lane.b32.xlu0 %v766_v63, %s1480_s21 }
 0xcf2   :  { %v769_v1 = vpop.permute.xlu0 %768 }
 0xcf3   :  { %v1958_v2 = vadd.f32 %v769_v1, %v761_v0 }
 0xcf5   :  { %1416 = vtanh.f32 %v1958_v2 }
 0xcfb   :  { %v1417_v3 = vpop.eup %1416 }
 0xcfc   :  { %774 = vrot.lane.b32.xlu1 %v1417_v3, %s1479_s17 }
 0xd6e   :  { %v775_v8 = vpop.permute.xlu1 %774 }
 0xd6f   :  { %v777_v9 = vmul.f32 %v775_v8, %v758_v62 }
 0xd71   :  { %779 = vrot.lane.b32.xlu2 %v777_v9, %s1480_s21 }
 0xdcb   :  { %v780_v10 = vpop.permute.xlu2 %779 }
 0xdcc   :  { %783 = vst.msk [vmem:[#allocation4 + $0x28] sm:$0xff] %vm37_vm0, %v780_v10  ;;  %1341 = vmatmul.msk.f32.vlgmr.msrb.gmra.mxu1 %vm37_vm0, %v780_v10 }
 0xdd3   :  { %v933_v12 = vld [vmem:[#allocation4 + $0x28] sm:$0xff] }
 0xdd4   :  { %1345 = vmatmul.msk.f32.vlgmr.msra.gmra.mxu1 %vm37_vm0, %v928_v11  ;;  %1350 = vmatmul.msk.f32.gmra.mxu3 %vm37_vm0, %v933_v12 }
 0xddc   :  { %1346 = vmatmul.msk.f32.gmra.mxu1 %vm37_vm0, %v929_v13 }
 0xde4   :  { %1347 = vmatmul.msk.f32.gmra.mxu1 %vm37_vm0, %v930_v14 }
 0xdec   :  { %1348 = vmatmul.msk.f32.gmra.mxu1 %vm37_vm0, %v931_v15 }
 0xe49   :  { %v809_v17 = vpop.f32.mrf.mxu1 }
 0xe4a   :  { %v1988_v18 = vadd.f32 %v809_v17, %v340_v16 }
 0xe4c   :  { %1418 = vtanh.f32 %v1988_v18  ;;  %v1342_v4 = vmul.f32 -1.442695, %v1988_v18 }
 0xe4e   :  { %1420 = vpow2.f32 %v1342_v4 }
 0xe51   :  { %v985_v19 = vpop.f32.mrf.mxu1 }
 0xe52   :  { %v1419_v20 = vpop.eup %1418  ;;  %v986_v21 = vadd.f32 %v1952_v38, %v985_v19 }
 0xe53   :  { %835 = vrot.lane.b32.xlu0 %v1419_v20, %s1479_s17 }
 0xe54   :  { %v1010_v22 = vrot.slane %v986_v21, 1  ;;  %v1011_v23 = vrot.slane %v986_v21, 2  ;;  %v1012_v24 = vrot.slane %v986_v21, 3  ;;  %1024 = vst [vmem:[#allocation7] sm:$0x1] %v986_v21  ;;  %v1013_v25 = vrot.slane %v986_v21, 4  ;;  %v1421_v5 = vpop.eup %1420 }
 0xe55   :  { %v1014_v26 = vrot.slane %v986_v21, 5  ;;  %v1015_v27 = vrot.slane %v986_v21, 6  ;;  %v1016_v32 = vrot.slane %v986_v21, 7  ;;  %v816_v6 = vadd.f32 1.0, %v1421_v5 }
 0xe56   :  { %1025 = vst [vmem:[#allocation7 + $0x8] sm:$0x1] %v1010_v22 }
 0xe57   :  { %1026 = vst [vmem:[#allocation7 + $0x10] sm:$0x1] %v1011_v23  ;;  %v1000_v29 = vpop.f32.mrf.mxu3  ;;  %1422 = vrcp.f32 %v816_v6  ;;  %v828_v12 = vand.u32 2147483648, %v816_v6  ;;  %vm822_vm12 = vweird.f32 %v816_v6  ;;  %v826_v13 = vand.u32 2147483647, %v816_v6  ;;  %v859_v23 = vld [vmem:[%s2030_s4 + $0x8] sm:$0xff] }
 0xe58   :  { %1027 = vst [vmem:[#allocation7 + $0x18] sm:$0x1] %v1012_v24  ;;  %v1001_v28 = vadd.f32 %v1952_v38, %v1000_v29  ;;  %v858_v24 = vld [vmem:[%s2030_s4] sm:$0xff]  ;;  %878 = vmatpush.msra.mxu2 %v859_v23  ;;  %s1481_s4 = smov [#allocation7]  }
 0xe59   :  { %1028 = vst [vmem:[#allocation7 + $0x20] sm:$0x1] %v1013_v25  ;;  %v988_v31 = vpop.f32.mrf.mxu1  ;;  %v829_v15 = vor.u32 1.1754944e-38, %v828_v12  ;;  %vm827_vm14 = vcmp.eq.f32.partialorder %v826_v13, 8.507059e+37  ;;  %v1436_v29 = vld [vmem:[%s2031_s5] ss:$0 sm:$0xff] }
 0xe5a   :  { %1029 = vst [vmem:[#allocation7 + $0x28] sm:$0x1] %v1014_v26  ;;  %v1125_v33 = vrot.slane %v1001_v28, 1  ;;  %v1126_v34 = vrot.slane %v1001_v28, 2  ;;  %v1127_v35 = vrot.slane %v1001_v28, 3  ;;  %v1128_v36 = vrot.slane %v1001_v28, 4  ;;  %879 = vmatpush.msra.mxu2 %v858_v24 }
 0xe5b   :  { %1030 = vst [vmem:[#allocation7 + $0x30] sm:$0x1] %v1015_v27  ;;  %v1129_v37 = vrot.slane %v1001_v28, 5  ;;  %v989_v39 = vadd.f32 %v1952_v38, %v988_v31  ;;  %v1130_v40 = vrot.slane %v1001_v28, 6  ;;  %v1131_v41 = vrot.slane %v1001_v28, 7  ;;  %s1197_s5 = sshll.u32 %s1481_s4, 4  ;;  %s1198_s5 = int_to_ptr.vmem [resolvable:$true] %s1197_s5 }
 0xe5c   :  { %1031 = vst [vmem:[#allocation7 + $0x38] sm:$0x1] %v1016_v32  ;;  %v343_v32 = vadd.f32 %v1436_v29, %v1697_v30 }
 0xe5d   :  { %1139 = vst [vmem:[#allocation7 + $0x5] sm:$0x1] %v1001_v28  ;;  %v1033_v43 = vrot.slane %v989_v39, 1  ;;  %v1034_v44 = vrot.slane %v989_v39, 2  ;;  %v1035_v45 = vrot.slane %v989_v39, 3  ;;  %v1036_v46 = vrot.slane %v989_v39, 4  ;;  %v1423_v7 = vpop.eup %1422 }
 0xe5e   :  { %1140 = vst [vmem:[#allocation7 + $0xd] sm:$0x1] %v1125_v33  ;;  %v1037_v47 = vrot.slane %v989_v39, 5  ;;  %v1038_v49 = vrot.slane %v989_v39, 6  ;;  %v1039_v50 = vrot.slane %v989_v39, 7  ;;  %v818_v8 = vmul.f32 %v1423_v7, %v816_v6 }
 0xe5f   :  { %1141 = vst [vmem:[#allocation7 + $0x15] sm:$0x1] %v1126_v34  ;;  %vm823_vm11 = vweird.f32 %v1423_v7 }
 0xe60   :  { %1142 = vst [vmem:[#allocation7 + $0x1d] sm:$0x1] %v1127_v35  ;;  %v819_v9 = vsub.f32 1.0, %v818_v8  ;;  %vm824_vm13 = vmor %vm822_vm12, %vm823_vm11 }
 0xe61   :  { %1143 = vst [vmem:[#allocation7 + $0x25] sm:$0x1] %v1128_v36  ;;  %v991_v42 = vpop.f32.mrf.mxu1 }
 0xe62   :  { %1144 = vst [vmem:[#allocation7 + $0x2d] sm:$0x1] %v1129_v37  ;;  %v992_v48 = vadd.f32 %v1952_v38, %v991_v42  ;;  %v820_v10 = vmul.f32 %v1423_v7, %v819_v9 }
 0xe63   :  { %1145 = vst [vmem:[#allocation7 + $0x35] sm:$0x1] %v1130_v40 }
 0xe64   :  { %1146 = vst [vmem:[#allocation7 + $0x3d] sm:$0x1] %v1131_v41  ;;  %v1056_v51 = vrot.slane %v992_v48, 1  ;;  %v1057_v52 = vrot.slane %v992_v48, 2  ;;  %v1058_v54 = vrot.slane %v992_v48, 3  ;;  %v1059_v55 = vrot.slane %v992_v48, 4 }
 0xe65   :  { %1047 = vst [vmem:[#allocation7 + $0x1] sm:$0x1] %v989_v39  ;;  %v1060_v56 = vrot.slane %v992_v48, 5  ;;  %v1061_v58 = vrot.slane %v992_v48, 6  ;;  %v1062_v59 = vrot.slane %v992_v48, 7  ;;  %v821_v11 = vadd.f32 %v1423_v7, %v820_v10 }
 0xe66   :  { %1048 = vst [vmem:[#allocation7 + $0x9] sm:$0x1] %v1033_v43 }
 0xe67   :  { %1049 = vst [vmem:[#allocation7 + $0x11] sm:$0x1] %v1034_v44  ;;  %v825_v14 = vsel %vm824_vm13, %v1423_v7, %v821_v11 }
 0xe68   :  { %1050 = vst [vmem:[#allocation7 + $0x19] sm:$0x1] %v1035_v45  ;;  %v830_v17 = vsel %vm827_vm14, %v829_v15, %v825_v14 }
 0xe69   :  { %1051 = vst [vmem:[#allocation7 + $0x21] sm:$0x1] %v1036_v46  ;;  %v994_v53 = vpop.f32.mrf.mxu1  ;;  %v833_v19 = vmul.f32 %v830_v17, %v1958_v2 }
 0xe6a   :  { %1052 = vst [vmem:[#allocation7 + $0x29] sm:$0x1] %v1037_v47  ;;  %v995_v57 = vadd.f32 %v1952_v38, %v994_v53 }
 0xe6b   :  { %1053 = vst [vmem:[#allocation7 + $0x31] sm:$0x1] %v1038_v49 }
 0xe6c   :  { %1054 = vst [vmem:[#allocation7 + $0x39] sm:$0x1] %v1039_v50  ;;  %v1079_v60 = vrot.slane %v995_v57, 1  ;;  %v1080_v61 = vrot.slane %v995_v57, 2  ;;  %v1081_v62 = vrot.slane %v995_v57, 3  ;;  %v1082_v63 = vrot.slane %v995_v57, 4 }
 0xe6d   :  { %1070 = vst [vmem:[#allocation7 + $0x2] sm:$0x1] %v992_v48  ;;  %v1083_v0 = vrot.slane %v995_v57, 5  ;;  %v1084_v1 = vrot.slane %v995_v57, 6  ;;  %v1085_v3 = vrot.slane %v995_v57, 7 }
 0xe6e   :  { %1071 = vst [vmem:[#allocation7 + $0xa] sm:$0x1] %v1056_v51 }
 0xe6f   :  { %1072 = vst [vmem:[#allocation7 + $0x12] sm:$0x1] %v1057_v52 }
 0xe70   :  { %1073 = vst [vmem:[#allocation7 + $0x1a] sm:$0x1] %v1058_v54 }
 0xe71   :  { %1074 = vst [vmem:[#allocation7 + $0x22] sm:$0x1] %v1059_v55 }
 0xe72   :  { %1075 = vst [vmem:[#allocation7 + $0x2a] sm:$0x1] %v1060_v56 }
 0xe73   :  { %1076 = vst [vmem:[#allocation7 + $0x32] sm:$0x1] %v1061_v58 }
 0xe74   :  { %1077 = vst [vmem:[#allocation7 + $0x3a] sm:$0x1] %v1062_v59 }
 0xe75   :  { %1093 = vst [vmem:[#allocation7 + $0x3] sm:$0x1] %v995_v57 }
 0xe76   :  { %1094 = vst [vmem:[#allocation7 + $0xb] sm:$0x1] %v1079_v60 }
 0xe77   :  { %1095 = vst [vmem:[#allocation7 + $0x13] sm:$0x1] %v1080_v61 }
 0xe78   :  { %1096 = vst [vmem:[#allocation7 + $0x1b] sm:$0x1] %v1081_v62 }
 0xe79   :  { %1097 = vst [vmem:[#allocation7 + $0x23] sm:$0x1] %v1082_v63 }
 0xe7a   :  { %1098 = vst [vmem:[#allocation7 + $0x2b] sm:$0x1] %v1083_v0 }
 0xe7b   :  { %1099 = vst [vmem:[#allocation7 + $0x33] sm:$0x1] %v1084_v1 }
 0xe7c   :  { %1100 = vst [vmem:[#allocation7 + $0x3b] sm:$0x1] %v1085_v3 }
 0xec5   :  { %v836_v16 = vpop.permute.xlu0 %835 }
 0xec6   :  { %v838_v18 = vmul.f32 %v836_v16, %v830_v17 }
 0xec8   :  { %840 = vrot.lane.b32.xlu1 %v838_v18, %s1480_s21 }
 0xf3a   :  { %v841_v20 = vpop.permute.xlu1 %840 }
 0xf3b   :  { %v843_v21 = vadd.f32 %v841_v20, %v833_v19 }
 0xf3d   :  { %1424 = vtanh.f32 %v843_v21 }
 0xf43   :  { %v1425_v22 = vpop.eup %1424 }
 0xf44   :  { %846 = vrot.lane.b32.xlu2 %v1425_v22, %s1479_s17 }
 0xf9e   :  { %v847_v25 = vpop.permute.xlu2 %846 }
 0xf9f   :  { %v849_v26 = vmul.f32 %v847_v25, %v830_v17 }
 0xfa1   :  { %851 = vrot.lane.b32.xlu0 %v849_v26, %s1480_s21 }
0x1013   :  { %v852_v2 = vpop.permute.xlu0 %851 }
0x1014   :  { %855 = vst.msk [vmem:[#allocation4 + $0x30] sm:$0xff] %vm37_vm0, %v852_v2  ;;  %1343 = vmatmul.msk.f32.vlgmr.msra.gmra.mxu2 %vm37_vm0, %v852_v2 }
0x101b   :  { %v934_v27 = vld [vmem:[#allocation4 + $0x30] sm:$0xff] }
0x101c   :  { %1351 = vmatmul.msk.f32.gmra.mxu3 %vm37_vm0, %v934_v27 }
0x1097   :  { %v881_v28 = vpop.f32.mrf.mxu2 }
0x1098   :  { %v884_v31 = vadd.f32 %v881_v28, %v343_v32 }
0x109a   :  { %1426 = vtanh.f32 %v884_v31  ;;  %v1344_v30 = vmul.f32 -1.442695, %v884_v31 }
0x109c   :  { %1428 = vpow2.f32 %v1344_v30 }
0x109f   :  { %v1003_v33 = vpop.f32.mrf.mxu3 }
0x10a0   :  { %v1427_v34 = vpop.eup %1426  ;;  %v1004_v35 = vadd.f32 %v1952_v38, %v1003_v33 }
0x10a1   :  { %907 = vrot.lane.b32.xlu1 %v1427_v34, %s1479_s17 }
0x10a2   :  { %v1148_v36 = vrot.slane %v1004_v35, 1  ;;  %v1149_v37 = vrot.slane %v1004_v35, 2  ;;  %v1150_v39 = vrot.slane %v1004_v35, 3  ;;  %1162 = vst [vmem:[#allocation7 + $0x6] sm:$0x1] %v1004_v35  ;;  %v1151_v40 = vrot.slane %v1004_v35, 4  ;;  %v1429_v44 = vpop.eup %1428 }
0x10a3   :  { %v1152_v41 = vrot.slane %v1004_v35, 5  ;;  %v1153_v42 = vrot.slane %v1004_v35, 6  ;;  %v1154_v43 = vrot.slane %v1004_v35, 7  ;;  %v888_v45 = vadd.f32 1.0, %v1429_v44 }
0x10a4   :  { %1163 = vst [vmem:[#allocation7 + $0xe] sm:$0x1] %v1148_v36 }
0x10a5   :  { %1164 = vst [vmem:[#allocation7 + $0x16] sm:$0x1] %v1149_v37  ;;  %1430 = vrcp.f32 %v888_v45  ;;  %v900_v51 = vand.u32 2147483648, %v888_v45  ;;  %vm894_vm2 = vweird.f32 %v888_v45  ;;  %v898_v52 = vand.u32 2147483647, %v888_v45 }
0x10a6   :  { %1165 = vst [vmem:[#allocation7 + $0x1e] sm:$0x1] %v1150_v39 }
0x10a7   :  { %1166 = vst [vmem:[#allocation7 + $0x26] sm:$0x1] %v1151_v40  ;;  %v901_v54 = vor.u32 1.1754944e-38, %v900_v51  ;;  %vm899_vm4 = vcmp.eq.f32.partialorder %v898_v52, 8.507059e+37 }
0x10a8   :  { %1167 = vst [vmem:[#allocation7 + $0x2e] sm:$0x1] %v1152_v41 }
0x10a9   :  { %1168 = vst [vmem:[#allocation7 + $0x36] sm:$0x1] %v1153_v42 }
0x10aa   :  { %1169 = vst [vmem:[#allocation7 + $0x3e] sm:$0x1] %v1154_v43 }
0x10ab   :  { %v1431_v46 = vpop.eup %1430 }
0x10ac   :  { %v890_v47 = vmul.f32 %v1431_v46, %v888_v45  ;;  %vm895_vm15 = vweird.f32 %v1431_v46 }
0x10ad   :  { %vm896_vm3 = vmor %vm894_vm2, %vm895_vm15 }
0x10ae   :  { %v891_v48 = vsub.f32 1.0, %v890_v47 }
0x10b0   :  { %v892_v49 = vmul.f32 %v1431_v46, %v891_v48 }
0x10b2   :  { %v893_v50 = vadd.f32 %v1431_v46, %v892_v49 }
0x10b4   :  { %v897_v53 = vsel %vm896_vm3, %v1431_v46, %v893_v50 }
0x10b5   :  { %v902_v56 = vsel %vm899_vm4, %v901_v54, %v897_v53 }
0x10b6   :  { %v905_v58 = vmul.f32 %v902_v56, %v843_v21 }
0x1113   :  { %v908_v55 = vpop.permute.xlu1 %907 }
0x1114   :  { %v910_v57 = vmul.f32 %v908_v55, %v902_v56 }
0x1116   :  { %912 = vrot.lane.b32.xlu2 %v910_v57, %s1480_s21 }
0x1170   :  { %v913_v59 = vpop.permute.xlu2 %912 }
0x1171   :  { %v915_v60 = vadd.f32 %v913_v59, %v905_v58 }
0x1173   :  { %1432 = vtanh.f32 %v915_v60 }
0x1179   :  { %v1433_v61 = vpop.eup %1432 }
0x117a   :  { %918 = vrot.lane.b32.xlu0 %v1433_v61, %s1479_s17 }
0x11ec   :  { %v919_v62 = vpop.permute.xlu0 %918 }
0x11ed   :  { %v921_v63 = vmul.f32 %v919_v62, %v902_v56 }
0x11ef   :  { %923 = vrot.lane.b32.xlu1 %v921_v63, %s1480_s21 }
0x1261   :  { %v924_v0 = vpop.permute.xlu1 %923 }
0x1262   :  { %927 = vst.msk [vmem:[#allocation4 + $0x38] sm:$0xff] %vm37_vm0, %v924_v0 }
0x1269   :  { %v935_v1 = vld [vmem:[#allocation4 + $0x38] sm:$0xff] }
0x126a   :  { %1352 = vmatmul.msk.f32.gmra.mxu3 %vm37_vm0, %v935_v1 }
0x12ed   :  { %v1006_v3 = vpop.f32.mrf.mxu3 }
0x12ee   :  { %v1007_v4 = vadd.f32 %v1952_v38, %v1006_v3 }
0x12f0   :  { %v1171_v5 = vrot.slane %v1007_v4, 1  ;;  %v1172_v6 = vrot.slane %v1007_v4, 2  ;;  %v1173_v7 = vrot.slane %v1007_v4, 3  ;;  %1185 = vst [vmem:[#allocation7 + $0x7] sm:$0x1] %v1007_v4  ;;  %v1174_v8 = vrot.slane %v1007_v4, 4 }
0x12f1   :  { %v1175_v9 = vrot.slane %v1007_v4, 5  ;;  %v1176_v10 = vrot.slane %v1007_v4, 6  ;;  %v1177_v11 = vrot.slane %v1007_v4, 7 }
0x12f2   :  { %1186 = vst [vmem:[#allocation7 + $0xf] sm:$0x1] %v1171_v5 }
0x12f3   :  { %1187 = vst [vmem:[#allocation7 + $0x17] sm:$0x1] %v1172_v6 }
0x12f4   :  { %1188 = vst [vmem:[#allocation7 + $0x1f] sm:$0x1] %v1173_v7 }
0x12f5   :  { %1189 = vst [vmem:[#allocation7 + $0x27] sm:$0x1] %v1174_v8 }
0x12f6   :  { %1190 = vst [vmem:[#allocation7 + $0x2f] sm:$0x1] %v1175_v9 }
0x12f7   :  { %1191 = vst [vmem:[#allocation7 + $0x37] sm:$0x1] %v1176_v10 }
0x12f8   :  { %1192 = vst [vmem:[#allocation7 + $0x3f] sm:$0x1] %v1177_v11 }
0x12f9   :  { %1205 = dma.vmem_to_hbm [thread:$0]  %s1198_s5, 1024, %s1200_s1, [#allocation8], %s1482_s11, %s1482_s11, %s1483_s3  }
0x12fa   :  { %1475 = dma.done.wait [#allocation8], 1024  }
0x12fb   :  { %1476 = vsyncadd [#allocation8], 4294966272 }
0x12fc   :  { %1210 = vsyncpa [#allocation8], 1 }

</bundles_post_ra>
